<compile_context>
chip_gen: v7x
topology: tpu7x:2x2x1
jax: 0.10.0
libtpu: 0.0.40
codegen_flags: <defaults>
</compile_context>

<pallas_src>
import functools
import math

import jax
import jax.numpy as jnp
from jax.experimental import pallas as pl
from jax.experimental.pallas import tpu as pltpu


VMEM_LIMIT = 32 * 1024 * 1024  # explicit scoped-VMEM budget (safe on v5e/v6e/v7x)


def _pick_tile(L, cap=32):
    """Query-row tile: multiple of 8 dividing L (or L itself when small)."""
    if L <= cap:
        return L
    for t in range(cap, 0, -1):
        if L % t == 0 and t % 8 == 0:
            return t
    return L


# -----------------------------------------------------------------------------
# Kernel 1: combined attention bias (lane-dense) + head-mean of the pair bias
#   pair_feat_bias = Linear(P, H, bias=False)(SiLU(pair_feat))        (Sequential(SiLU, Linear))
#   combined_bias  = pair_feat_bias (permuted to B,H,L,L) + mixed_attn_bias + key-padding(-1e9)
#   pfb_mean       = pair_feat_bias.mean(dim=heads)                    (for the top-k gather)
# -----------------------------------------------------------------------------
def pair_bias_kernel(pf_ref, mix_ref, maskk_ref, w_ref, bias_ref, mean_ref):
    tq, L, P = pf_ref.shape[1], pf_ref.shape[2], pf_ref.shape[3]

    pf = pf_ref[0]                                   # (TQ, L, P)  f32
    pf = pf * jax.nn.sigmoid(pf)                     # SiLU (applied before the linear)
    pf2 = pf.reshape(tq * L, P).astype(jnp.bfloat16)  # merge leading dims -> one big matmul

    # (H, TQ*L) = W(H,P) @ SiLU(pf)^T  -- standard trans_b MXU form, lane-dense along keys
    yt = jax.lax.dot_general(
        w_ref[...], pf2, (((1,), (1,)), ((), ())),
        preferred_element_type=jnp.float32)          # (H, TQ*L)
    meanv = jnp.mean(yt, axis=0, keepdims=True)      # (1, TQ*L)  head-mean of the pure pair bias

    maskterm = jnp.where(maskk_ref[0] > 0, -1e9, 0.0)  # (1, L) additive key-padding term

    # small static loop: slices + VPU adds + stores only (the matmul above is already done)
    for t in range(tq):
        sl = yt[:, t * L:(t + 1) * L]                # (H, L)
        bias_ref[0, :, t, :] = (sl + mix_ref[0, :, t, :] + maskterm).astype(jnp.bfloat16)
        mean_ref[0, t:t + 1, :] = meanv[:, t * L:(t + 1) * L]


def pair_bias_call(pair_feat, mixed_bias, mask_key, w_hp, num_heads):
    B, L, _, P = pair_feat.shape
    H = num_heads
    tq = _pick_tile(L)
    nq = L // tq
    return pl.pallas_call(
        pair_bias_kernel,
        out_shape=(jax.ShapeDtypeStruct((B, H, L, L), jnp.bfloat16),
                   jax.ShapeDtypeStruct((B, L, L), jnp.float32)),
        grid=(B, nq),
        in_specs=[
            pl.BlockSpec((1, tq, L, P), lambda b, q: (b, q, 0, 0)),   # pair_feat tile
            pl.BlockSpec((1, H, tq, L), lambda b, q: (b, 0, q, 0)),   # mixed attn bias tile
            pl.BlockSpec((1, 1, L), lambda b, q: (b, 0, 0)),          # key padding mask
            pl.BlockSpec((H, P), lambda b, q: (0, 0)),                # pair-bias weight (H, P)
        ],
        out_specs=(pl.BlockSpec((1, H, tq, L), lambda b, q: (b, 0, q, 0)),
                   pl.BlockSpec((1, tq, L), lambda b, q: (b, q, 0))),
        compiler_params=pltpu.CompilerParams(
            dimension_semantics=("parallel", "parallel"),
            vmem_limit_bytes=VMEM_LIMIT),
    )(pair_feat.astype(jnp.float32), mixed_bias.astype(jnp.float32), mask_key, w_hp)


# -----------------------------------------------------------------------------
# Kernel 2: conditioning stream  c = x + pair2node(feat2node)
#   pair2node = Linear(P,P,no bias) -> SiLU -> Linear(P,D,no bias)
# -----------------------------------------------------------------------------
def cond_kernel(x_ref, f_ref, w1_ref, w2_ref, c_ref):
    f = f_ref[0].astype(jnp.bfloat16)                                    # (L, P)
    h1 = jnp.dot(f, w1_ref[...], preferred_element_type=jnp.float32)    # (L, P)
    h1 = (h1 * jax.nn.sigmoid(h1)).astype(jnp.bfloat16)
    f2n = jnp.dot(h1, w2_ref[...], preferred_element_type=jnp.float32)  # (L, D)
    c_ref[0] = x_ref[0] + f2n


def cond_call(x, feat2node, w1, w2):
    B, L, D = x.shape
    P = feat2node.shape[-1]
    return pl.pallas_call(
        cond_kernel,
        out_shape=jax.ShapeDtypeStruct((B, L, D), jnp.float32),
        grid=(B,),
        in_specs=[
            pl.BlockSpec((1, L, D), lambda b: (b, 0, 0)),
            pl.BlockSpec((1, L, P), lambda b: (b, 0, 0)),
            pl.BlockSpec((P, P), lambda b: (0, 0)),
            pl.BlockSpec((P, D), lambda b: (0, 0)),
        ],
        out_specs=pl.BlockSpec((1, L, D), lambda b: (b, 0, 0)),
        compiler_params=pltpu.CompilerParams(
            dimension_semantics=("parallel",),
            vmem_limit_bytes=VMEM_LIMIT),
    )(x, feat2node.astype(jnp.float32), w1, w2)


# -----------------------------------------------------------------------------
# Kernel 3: fused DiT stack (pos_emb init + per-layer adaLN / MHA / MLP), grid = (batch, layer)
# -----------------------------------------------------------------------------
def dit_stack_kernel(pos_ref, maskr_ref, c_ref, te_ref, bias_ref, posw_ref,
                     adaw_ref, adab_ref, wqkv_ref, bqkv_ref, wo_ref, bo_ref,
                     w1_ref, b1_ref, w2_ref, b2_ref,
                     out_ref, h_ref, sc_ref, attn_ref, *, num_heads):
    l_idx = pl.program_id(1)
    L, D = h_ref.shape
    H = num_heads
    Dh = D // H
    scale = 1.0 / math.sqrt(Dh)

    @pl.when(l_idx == 0)
    def _init():
        # pos_emb = Linear(3, D, bias=False)(pos).masked_fill(padding, 0)  -- 3 broadcast FMAs
        pos = pos_ref[0]                               # (L, 3)
        w = posw_ref[...]                              # (3, D)
        pe = (pos[:, 0:1] * w[0:1, :]
              + pos[:, 1:2] * w[1:2, :]
              + pos[:, 2:3] * w[2:3, :])
        h_ref[...] = jnp.where(maskr_ref[0] > 0, 0.0, pe)
        # SiLU(conditioning) is layer-invariant: compute once, keep in bf16 for the adaLN matmul
        c0 = c_ref[0]
        sc_ref[...] = (c0 * jax.nn.sigmoid(c0)).astype(jnp.bfloat16)

    # layer input = pos_embedding + time_emb  (added every layer, as in the reference loop)
    h = h_ref[...] + te_ref[0]

    # adaLN modulation from the encoder output
    mod = jnp.dot(sc_ref[...], adaw_ref[0],
                  preferred_element_type=jnp.float32) + adab_ref[0]       # (L, 6D)
    shift_msa = mod[:, 0 * D:1 * D]
    scale_msa = mod[:, 1 * D:2 * D]
    gate_msa = mod[:, 2 * D:3 * D]
    shift_mlp = mod[:, 3 * D:4 * D]
    scale_mlp = mod[:, 4 * D:5 * D]
    gate_mlp = mod[:, 5 * D:6 * D]

    def layernorm(x):  # elementwise_affine=False
        mu = jnp.mean(x, axis=-1, keepdims=True)
        xc = x - mu
        var = jnp.mean(xc * xc, axis=-1, keepdims=True)
        return xc * jax.lax.rsqrt(var + 1e-6)

    # --- attention branch ---
    x1 = (layernorm(h) * (1.0 + scale_msa) + shift_msa).astype(jnp.bfloat16)
    qkv = jnp.dot(x1, wqkv_ref[0], preferred_element_type=jnp.float32) + bqkv_ref[0]  # (L, 3D)
    q = (qkv[:, 0:D] * scale).astype(jnp.bfloat16)
    k = qkv[:, D:2 * D].astype(jnp.bfloat16)
    v = qkv[:, 2 * D:3 * D].astype(jnp.bfloat16)

    for hd in range(H):                              # small static head loop (no concatenate)
        sl = slice(hd * Dh, (hd + 1) * Dh)
        s = jax.lax.dot_general(q[:, sl], k[:, sl], (((1,), (1,)), ((), ())),
                                preferred_element_type=jnp.float32)       # (L, L)
        s = s + bias_ref[0, hd]                       # bias already includes key-padding (-1e9)
        m = jnp.max(s, axis=-1, keepdims=True)
        e = jnp.exp(s - m)
        p = e * pl.reciprocal(jnp.sum(e, axis=-1, keepdims=True), approx=True)
        attn_ref[:, sl] = jnp.dot(p.astype(jnp.bfloat16), v[:, sl],
                                  preferred_element_type=jnp.float32)     # write head slice
    attn = jnp.dot(attn_ref[...].astype(jnp.bfloat16), wo_ref[0],
                   preferred_element_type=jnp.float32) + bo_ref[0]
    h = h + gate_msa * attn

    # --- MLP branch ---
    x2 = (layernorm(h) * (1.0 + scale_mlp) + shift_mlp).astype(jnp.bfloat16)
    m1 = jnp.dot(x2, w1_ref[0], preferred_element_type=jnp.float32) + b1_ref[0]
    m1 = jax.nn.gelu(m1, approximate=True).astype(jnp.bfloat16)
    m2 = jnp.dot(m1, w2_ref[0], preferred_element_type=jnp.float32) + b2_ref[0]
    h = h + gate_mlp * m2

    h_ref[...] = h                                    # hidden state stays resident across layers

    @pl.when(l_idx == pl.num_programs(1) - 1)
    def _finalize():
        out_ref[0] = h


def dit_stack_call(pos, mask_row, c, time_emb, bias, params, num_heads):
    B, L, D = c.shape
    NL = params["ada_w"].shape[0]
    H = num_heads
    Dm = params["w1"].shape[2]

    def per_b(shape):  # per-batch blocks, constant over the layer axis (no re-DMA per layer)
        nd = len(shape)
        return pl.BlockSpec((1,) + shape[1:], lambda b, l: (b,) + (0,) * (nd - 1))

    def per_l(shape):  # stacked per-layer weights, pipelined along the layer axis
        nd = len(shape)
        return pl.BlockSpec((1,) + shape[1:], lambda b, l: (l,) + (0,) * (nd - 1))

    kern = functools.partial(dit_stack_kernel, num_heads=H)
    return pl.pallas_call(
        kern,
        out_shape=jax.ShapeDtypeStruct((B, L, D), jnp.float32),
        grid=(B, NL),
        in_specs=[
            per_b((B, L, 3)),                                 # pos
            per_b((B, L, 1)),                                 # row padding mask (1.0 = pad)
            per_b((B, L, D)),                                 # conditioning (x + feat2node)
            per_b((B, L, D)),                                 # time_emb
            per_b((B, H, L, L)),                              # combined attn bias (bf16)
            pl.BlockSpec((3, D), lambda b, l: (0, 0)),        # pos_emb weight
            per_l((NL, D, 6 * D)), per_l((NL, 1, 6 * D)),     # adaLN modulation
            per_l((NL, D, 3 * D)), per_l((NL, 1, 3 * D)),     # fused QKV
            per_l((NL, D, D)), per_l((NL, 1, D)),             # attn out proj
            per_l((NL, D, Dm)), per_l((NL, 1, Dm)),           # mlp fc1
            per_l((NL, Dm, D)), per_l((NL, 1, D)),            # mlp fc2
        ],
        out_specs=per_b((B, L, D)),
        scratch_shapes=[
            pltpu.VMEM((L, D), jnp.float32),    # hidden state (pos_embedding), layer-resident
            pltpu.VMEM((L, D), jnp.bfloat16),   # SiLU(conditioning), computed once per batch elt
            pltpu.VMEM((L, D), jnp.float32),    # per-head attention outputs gathered here
        ],
        compiler_params=pltpu.CompilerParams(
            dimension_semantics=("parallel", "arbitrary"),
            vmem_limit_bytes=VMEM_LIMIT),
    )(pos, mask_row, c, time_emb, bias,
      params["pos_emb_w"],
      params["ada_w"], params["ada_b"],
      params["w_qkv"], params["b_qkv"],
      params["wo"], params["bo"],
      params["w1"], params["b1"],
      params["w2"], params["b2"])


# -----------------------------------------------------------------------------
# Parameter init (deterministic, synthetic)
# -----------------------------------------------------------------------------
def init_params(key, D, P, H, num_layers, mlp_ratio=4):
    ks = iter(jax.random.split(key, 32))
    Dm = mlp_ratio * D

    def nrm(shape, s=0.02, dtype=jnp.bfloat16):
        return (s * jax.random.normal(next(ks), shape, jnp.float32)).astype(dtype)

    def stack(shape, s=0.02, dtype=jnp.bfloat16):
        return (s * jax.random.normal(next(ks), (num_layers,) + shape, jnp.float32)).astype(dtype)

    return {
        "pos_emb_w": nrm((3, D), 0.1, jnp.float32),       # Linear(3, D, bias=False), (in, out)
        "pair_bias_w": nrm((H, P), 0.1),                  # Linear(P, H, bias=False), stored (H, P)
        "pair2node_w1": nrm((P, P), 0.1),
        "pair2node_w2": nrm((P, D), 0.1),
        # stacked per-layer DiT block weights (NL leading axis)
        "ada_w": stack((D, 6 * D)), "ada_b": stack((1, 6 * D), dtype=jnp.float32),
        "w_qkv": stack((D, 3 * D)), "b_qkv": stack((1, 3 * D), dtype=jnp.float32),
        "wo": stack((D, D)), "bo": stack((1, D), dtype=jnp.float32),
        "w1": stack((D, Dm)), "b1": stack((1, Dm), dtype=jnp.float32),
        "w2": stack((Dm, D)), "b2": stack((1, D), dtype=jnp.float32),
    }


# -----------------------------------------------------------------------------
# DiffusionModule2.forward
# -----------------------------------------------------------------------------
def diffusion_module_forward(params, batched_data, x, time_emb, padding_mask,
                             mixed_attn_bias=None, pair_feat=None, num_heads=4):
    pos = batched_data["pos"].astype(jnp.float32)            # [B, L, 3]
    B, L, _ = pos.shape
    D = params["pos_emb_w"].shape[1]
    H = num_heads

    x = jnp.transpose(x, (1, 0, 2)).astype(jnp.float32)      # x.transpose(0,1): [L,B,D]->[B,L,D]
    maskf = padding_mask.astype(jnp.float32)
    mask_row = maskf[:, :, None]                              # [B, L, 1]
    mask_key = maskf[:, None, :]                              # [B, 1, L]

    mixed = (mixed_attn_bias if mixed_attn_bias is not None
             else jnp.zeros((B, H, L, L), jnp.float32))

    if pair_feat is not None:
        bias, pfb_mean = pair_bias_call(pair_feat, mixed, mask_key,
                                        params["pair_bias_w"], H)
        # feat2node path: mask pair_feat, top-3 over the query dim of the head-mean bias,
        # gather, mean, then pair2node MLP.
        # TODO(synk): top_k/gather have no Pallas lowering (done in XLA; ties may differ from torch.topk).
        pf_m = jnp.where(padding_mask[:, None, :, None], 0.0, pair_feat)   # mask key dim (j)
        pf_m = jnp.where(padding_mask[:, :, None, None], 0.0, pf_m)        # mask query dim (i)
        _, idx = jax.lax.top_k(jnp.transpose(pfb_mean, (0, 2, 1)), 3)      # (B, Lj, 3) over i
        pf_t = jnp.transpose(pf_m, (0, 2, 1, 3))                           # (B, Lj, Li, P)
        gathered = jnp.take_along_axis(pf_t, idx[..., None], axis=2)       # (B, Lj, 3, P)
        feat2node = jnp.mean(gathered, axis=2)                             # (B, Lj, P)
        c = cond_call(x, feat2node, params["pair2node_w1"], params["pair2node_w2"])
    else:
        bias = (mixed + jnp.where(padding_mask[:, None, None, :], -1e9, 0.0)
                ).astype(jnp.bfloat16)
        c = x

    return dit_stack_call(pos, mask_row, c, time_emb.astype(jnp.float32), bias, params, H)


# -----------------------------------------------------------------------------
if __name__ == "__main__":
    B, L, D, H, P, NL = 2, 8, 32, 4, 16, 2   # batch, seq, embed_dim, heads, pair_dim, layers

    key = jax.random.PRNGKey(0)
    kp, kx, kt, kb, kf, kw = jax.random.split(key, 6)

    batched_data = {"pos": jax.random.normal(kp, (B, L, 3), jnp.float32)}
    x_enc = jax.random.normal(kx, (L, B, D), jnp.float32)            # [L, B, D] like PyTorch input
    time_emb = 0.1 * jax.random.normal(kt, (B, L, D), jnp.float32)
    mixed_attn_bias = 0.1 * jax.random.normal(kb, (B, H, L, L), jnp.float32)
    pair_feat = jax.random.normal(kf, (B, L, L, P), jnp.float32)

    # last two tokens of batch element 1 are padding
    padding_mask = jnp.array(
        [[False] * L, [False] * (L - 2) + [True, True]], dtype=jnp.bool_
    )

    params = init_params(kw, D, P, H, NL)

    out = diffusion_module_forward(
        params, batched_data, x_enc, time_emb, padding_mask,
        mixed_attn_bias=mixed_attn_bias, pair_feat=pair_feat, num_heads=H,
    )
    out = jax.block_until_ready(out)
    assert out.shape == (B, L, D)
    assert bool(jnp.all(jnp.isfinite(out)))
    print("KERNEL_OK")
</pallas_src>

<mosaic_0001>
module attributes {stable_mosaic.version = 11 : i64} {
  func.func @pair_bias_kernel(%arg0: i32, %arg1: i32, %arg2: memref<1x8x8x16xf32, #tpu.memory_space<vmem>>, %arg3: memref<1x4x8x8xf32, #tpu.memory_space<vmem>>, %arg4: memref<1x1x8xf32, #tpu.memory_space<vmem>>, %arg5: memref<4x16xbf16, #tpu.memory_space<vmem>>, %arg6: memref<1x4x8x8xbf16, #tpu.memory_space<vmem>>, %arg7: memref<1x8x8xf32, #tpu.memory_space<vmem>>) attributes {dimension_semantics = [#tpu.dimension_semantics<parallel>, #tpu.dimension_semantics<parallel>], iteration_bounds = array<i64: 2, 1>, scalar_prefetch = 0 : i64, scratch_operands = 0 : i64, tpu.core_type = #tpu.core_type<tc>, window_params = [{transform_indices = @transform_0, window_bounds = array<i64: 1, 8, 8, 16>}, {transform_indices = @transform_1, window_bounds = array<i64: 1, 4, 8, 8>}, {transform_indices = @transform_2, window_bounds = array<i64: 1, 1, 8>}, {pipeline_mode = #tpu.pipeline_mode<synchronous>, transform_indices = @transform_3, window_bounds = array<i64: 4, 16>}, {transform_indices = @transform_4, window_bounds = array<i64: 1, 4, 8, 8>}, {transform_indices = @transform_5, window_bounds = array<i64: 1, 8, 8>}]} {
    %c0 = arith.constant 0 : index
    %c0_0 = arith.constant 0 : index
    %c0_1 = arith.constant 0 : index
    %c0_2 = arith.constant 0 : index
    %0 = vector.load %arg2[%c0, %c0_0, %c0_1, %c0_2] : memref<1x8x8x16xf32, #tpu.memory_space<vmem>>, vector<1x8x8x16xf32>
    %1 = vector.shape_cast %0 : vector<1x8x8x16xf32> to vector<8x8x16xf32>
    %2 = arith.negf %1 : vector<8x8x16xf32>
    %3 = math.exp %2 : vector<8x8x16xf32>
    %cst = arith.constant 1.000000e+00 : f32
    %4 = vector.broadcast %cst : f32 to vector<8x8x16xf32>
    %5 = arith.addf %4, %3 : vector<8x8x16xf32>
    %6 = arith.divf %4, %5 : vector<8x8x16xf32>
    %7 = arith.mulf %1, %6 : vector<8x8x16xf32>
    %8 = vector.shape_cast %7 : vector<8x8x16xf32> to vector<64x16xf32>
    %9 = arith.truncf %8 : vector<64x16xf32> to vector<64x16xbf16>
    %c0_3 = arith.constant 0 : index
    %c0_4 = arith.constant 0 : index
    %10 = vector.load %arg5[%c0_3, %c0_4] : memref<4x16xbf16, #tpu.memory_space<vmem>>, vector<4x16xbf16>
    %cst_5 = arith.constant dense<0.000000e+00> : vector<4x64xf32>
    %11 = tpu.matmul %10, %9, %cst_5 {dimension_numbers = #tpu.dot_dimension_numbers<[1], [1], [0], [0], [0, 0, 1, 0], [], []>} : vector<4x16xbf16>, vector<64x16xbf16>, vector<4x64xf32> -> vector<4x64xf32>
    %cst_6 = arith.constant dense<0.000000e+00> : vector<64xf32>
    %12 = vector.multi_reduction <add>, %11, %cst_6 [0] : vector<4x64xf32> to vector<64xf32>
    %13 = vector.shape_cast %12 : vector<64xf32> to vector<1x64xf32>
    %cst_7 = arith.constant 4.000000e+00 : f32
    %14 = vector.broadcast %cst_7 : f32 to vector<1x64xf32>
    %15 = arith.divf %13, %14 : vector<1x64xf32>
    %c0_8 = arith.constant 0 : index
    %c0_9 = arith.constant 0 : index
    %c0_10 = arith.constant 0 : index
    %16 = vector.load %arg4[%c0_8, %c0_9, %c0_10] : memref<1x1x8xf32, #tpu.memory_space<vmem>>, vector<1x1x8xf32>
    %17 = vector.shape_cast %16 : vector<1x1x8xf32> to vector<1x8xf32>
    %cst_11 = arith.constant 0.000000e+00 : f32
    %18 = vector.broadcast %cst_11 : f32 to vector<1x8xf32>
    %19 = arith.cmpf ogt, %17, %18 : vector<1x8xf32>
    %cst_12 = arith.constant -1.000000e+09 : f32
    %cst_13 = arith.constant 0.000000e+00 : f32
    %20 = vector.broadcast %cst_12 : f32 to vector<1x8xf32>
    %21 = vector.broadcast %cst_13 : f32 to vector<1x8xf32>
    %22 = arith.select %19, %20, %21 : vector<1x8xi1>, vector<1x8xf32>
    %23 = vector.extract_strided_slice %11 {offsets = [0, 0], sizes = [4, 8], strides = [1, 1]} : vector<4x64xf32> to vector<4x8xf32>
    %c0_14 = arith.constant 0 : index
    %c0_15 = arith.constant 0 : index
    %c0_16 = arith.constant 0 : index
    %c0_17 = arith.constant 0 : index
    %24 = vector.load %arg3[%c0_14, %c0_15, %c0_16, %c0_17] : memref<1x4x8x8xf32, #tpu.memory_space<vmem>>, vector<1x4x1x8xf32>
    %25 = vector.shape_cast %24 : vector<1x4x1x8xf32> to vector<4x8xf32>
    %26 = arith.addf %23, %25 : vector<4x8xf32>
    %27 = vector.broadcast %22 : vector<1x8xf32> to vector<4x8xf32>
    %28 = arith.addf %26, %27 : vector<4x8xf32>
    %29 = arith.truncf %28 : vector<4x8xf32> to vector<4x8xbf16>
    %c0_18 = arith.constant 0 : index
    %c0_19 = arith.constant 0 : index
    %c0_20 = arith.constant 0 : index
    %c0_21 = arith.constant 0 : index
    %30 = vector.load %arg6[%c0_18, %c0_19, %c0_20, %c0_21] : memref<1x4x8x8xbf16, #tpu.memory_space<vmem>>, vector<1x4x1x8xbf16>
    %31 = vector.shape_cast %30 : vector<1x4x1x8xbf16> to vector<4x8xbf16>
    %32 = vector.shape_cast %29 : vector<4x8xbf16> to vector<1x4x1x8xbf16>
    tpu.vector_store %arg6[%c0_18, %c0_19, %c0_20, %c0_21], %32 {strides = array<i32>} : memref<1x4x8x8xbf16, #tpu.memory_space<vmem>>, vector<1x4x1x8xbf16>,
    %33 = vector.extract_strided_slice %15 {offsets = [0, 0], sizes = [1, 8], strides = [1, 1]} : vector<1x64xf32> to vector<1x8xf32>
    %c0_22 = arith.constant 0 : index
    %c0_23 = arith.constant 0 : index
    %c0_24 = arith.constant 0 : index
    %34 = vector.load %arg7[%c0_22, %c0_23, %c0_24] : memref<1x8x8xf32, #tpu.memory_space<vmem>>, vector<1x1x8xf32>
    %35 = vector.shape_cast %34 : vector<1x1x8xf32> to vector<1x8xf32>
    %36 = vector.shape_cast %33 : vector<1x8xf32> to vector<1x1x8xf32>
    tpu.vector_store %arg7[%c0_22, %c0_23, %c0_24], %36 {strides = array<i32>} : memref<1x8x8xf32, #tpu.memory_space<vmem>>, vector<1x1x8xf32>,
    %37 = vector.extract_strided_slice %11 {offsets = [0, 8], sizes = [4, 8], strides = [1, 1]} : vector<4x64xf32> to vector<4x8xf32>
    %c0_25 = arith.constant 0 : index
    %c0_26 = arith.constant 0 : index
    %c1 = arith.constant 1 : index
    %c0_27 = arith.constant 0 : index
    %38 = vector.load %arg3[%c0_25, %c0_26, %c1, %c0_27] : memref<1x4x8x8xf32, #tpu.memory_space<vmem>>, vector<1x4x1x8xf32>
    %39 = vector.shape_cast %38 : vector<1x4x1x8xf32> to vector<4x8xf32>
    %40 = arith.addf %37, %39 : vector<4x8xf32>
    %41 = vector.broadcast %22 : vector<1x8xf32> to vector<4x8xf32>
    %42 = arith.addf %40, %41 : vector<4x8xf32>
    %43 = arith.truncf %42 : vector<4x8xf32> to vector<4x8xbf16>
    %c0_28 = arith.constant 0 : index
    %c0_29 = arith.constant 0 : index
    %c1_30 = arith.constant 1 : index
    %c0_31 = arith.constant 0 : index
    %44 = vector.load %arg6[%c0_28, %c0_29, %c1_30, %c0_31] : memref<1x4x8x8xbf16, #tpu.memory_space<vmem>>, vector<1x4x1x8xbf16>
    %45 = vector.shape_cast %44 : vector<1x4x1x8xbf16> to vector<4x8xbf16>
    %46 = vector.shape_cast %43 : vector<4x8xbf16> to vector<1x4x1x8xbf16>
    tpu.vector_store %arg6[%c0_28, %c0_29, %c1_30, %c0_31], %46 {strides = array<i32>} : memref<1x4x8x8xbf16, #tpu.memory_space<vmem>>, vector<1x4x1x8xbf16>,
    %47 = vector.extract_strided_slice %15 {offsets = [0, 8], sizes = [1, 8], strides = [1, 1]} : vector<1x64xf32> to vector<1x8xf32>
    %c0_32 = arith.constant 0 : index
    %c1_33 = arith.constant 1 : index
    %c0_34 = arith.constant 0 : index
    %48 = vector.load %arg7[%c0_32, %c1_33, %c0_34] : memref<1x8x8xf32, #tpu.memory_space<vmem>>, vector<1x1x8xf32>
    %49 = vector.shape_cast %48 : vector<1x1x8xf32> to vector<1x8xf32>
    %50 = vector.shape_cast %47 : vector<1x8xf32> to vector<1x1x8xf32>
    tpu.vector_store %arg7[%c0_32, %c1_33, %c0_34], %50 {strides = array<i32>} : memref<1x8x8xf32, #tpu.memory_space<vmem>>, vector<1x1x8xf32>,
    %51 = vector.extract_strided_slice %11 {offsets = [0, 16], sizes = [4, 8], strides = [1, 1]} : vector<4x64xf32> to vector<4x8xf32>
    %c0_35 = arith.constant 0 : index
    %c0_36 = arith.constant 0 : index
    %c2 = arith.constant 2 : index
    %c0_37 = arith.constant 0 : index
    %52 = vector.load %arg3[%c0_35, %c0_36, %c2, %c0_37] : memref<1x4x8x8xf32, #tpu.memory_space<vmem>>, vector<1x4x1x8xf32>
    %53 = vector.shape_cast %52 : vector<1x4x1x8xf32> to vector<4x8xf32>
    %54 = arith.addf %51, %53 : vector<4x8xf32>
    %55 = vector.broadcast %22 : vector<1x8xf32> to vector<4x8xf32>
    %56 = arith.addf %54, %55 : vector<4x8xf32>
    %57 = arith.truncf %56 : vector<4x8xf32> to vector<4x8xbf16>
    %c0_38 = arith.constant 0 : index
    %c0_39 = arith.constant 0 : index
    %c2_40 = arith.constant 2 : index
    %c0_41 = arith.constant 0 : index
    %58 = vector.load %arg6[%c0_38, %c0_39, %c2_40, %c0_41] : memref<1x4x8x8xbf16, #tpu.memory_space<vmem>>, vector<1x4x1x8xbf16>
    %59 = vector.shape_cast %58 : vector<1x4x1x8xbf16> to vector<4x8xbf16>
    %60 = vector.shape_cast %57 : vector<4x8xbf16> to vector<1x4x1x8xbf16>
    tpu.vector_store %arg6[%c0_38, %c0_39, %c2_40, %c0_41], %60 {strides = array<i32>} : memref<1x4x8x8xbf16, #tpu.memory_space<vmem>>, vector<1x4x1x8xbf16>,
    %61 = vector.extract_strided_slice %15 {offsets = [0, 16], sizes = [1, 8], strides = [1, 1]} : vector<1x64xf32> to vector<1x8xf32>
    %c0_42 = arith.constant 0 : index
    %c2_43 = arith.constant 2 : index
    %c0_44 = arith.constant 0 : index
    %62 = vector.load %arg7[%c0_42, %c2_43, %c0_44] : memref<1x8x8xf32, #tpu.memory_space<vmem>>, vector<1x1x8xf32>
    %63 = vector.shape_cast %62 : vector<1x1x8xf32> to vector<1x8xf32>
    %64 = vector.shape_cast %61 : vector<1x8xf32> to vector<1x1x8xf32>
    tpu.vector_store %arg7[%c0_42, %c2_43, %c0_44], %64 {strides = array<i32>} : memref<1x8x8xf32, #tpu.memory_space<vmem>>, vector<1x1x8xf32>,
    %65 = vector.extract_strided_slice %11 {offsets = [0, 24], sizes = [4, 8], strides = [1, 1]} : vector<4x64xf32> to vector<4x8xf32>
    %c0_45 = arith.constant 0 : index
    %c0_46 = arith.constant 0 : index
    %c3 = arith.constant 3 : index
    %c0_47 = arith.constant 0 : index
    %66 = vector.load %arg3[%c0_45, %c0_46, %c3, %c0_47] : memref<1x4x8x8xf32, #tpu.memory_space<vmem>>, vector<1x4x1x8xf32>
    %67 = vector.shape_cast %66 : vector<1x4x1x8xf32> to vector<4x8xf32>
    %68 = arith.addf %65, %67 : vector<4x8xf32>
    %69 = vector.broadcast %22 : vector<1x8xf32> to vector<4x8xf32>
    %70 = arith.addf %68, %69 : vector<4x8xf32>
    %71 = arith.truncf %70 : vector<4x8xf32> to vector<4x8xbf16>
    %c0_48 = arith.constant 0 : index
    %c0_49 = arith.constant 0 : index
    %c3_50 = arith.constant 3 : index
    %c0_51 = arith.constant 0 : index
    %72 = vector.load %arg6[%c0_48, %c0_49, %c3_50, %c0_51] : memref<1x4x8x8xbf16, #tpu.memory_space<vmem>>, vector<1x4x1x8xbf16>
    %73 = vector.shape_cast %72 : vector<1x4x1x8xbf16> to vector<4x8xbf16>
    %74 = vector.shape_cast %71 : vector<4x8xbf16> to vector<1x4x1x8xbf16>
    tpu.vector_store %arg6[%c0_48, %c0_49, %c3_50, %c0_51], %74 {strides = array<i32>} : memref<1x4x8x8xbf16, #tpu.memory_space<vmem>>, vector<1x4x1x8xbf16>,
    %75 = vector.extract_strided_slice %15 {offsets = [0, 24], sizes = [1, 8], strides = [1, 1]} : vector<1x64xf32> to vector<1x8xf32>
    %c0_52 = arith.constant 0 : index
    %c3_53 = arith.constant 3 : index
    %c0_54 = arith.constant 0 : index
    %76 = vector.load %arg7[%c0_52, %c3_53, %c0_54] : memref<1x8x8xf32, #tpu.memory_space<vmem>>, vector<1x1x8xf32>
    %77 = vector.shape_cast %76 : vector<1x1x8xf32> to vector<1x8xf32>
    %78 = vector.shape_cast %75 : vector<1x8xf32> to vector<1x1x8xf32>
    tpu.vector_store %arg7[%c0_52, %c3_53, %c0_54], %78 {strides = array<i32>} : memref<1x8x8xf32, #tpu.memory_space<vmem>>, vector<1x1x8xf32>,
    %79 = vector.extract_strided_slice %11 {offsets = [0, 32], sizes = [4, 8], strides = [1, 1]} : vector<4x64xf32> to vector<4x8xf32>
    %c0_55 = arith.constant 0 : index
    %c0_56 = arith.constant 0 : index
    %c4 = arith.constant 4 : index
    %c0_57 = arith.constant 0 : index
    %80 = vector.load %arg3[%c0_55, %c0_56, %c4, %c0_57] : memref<1x4x8x8xf32, #tpu.memory_space<vmem>>, vector<1x4x1x8xf32>
    %81 = vector.shape_cast %80 : vector<1x4x1x8xf32> to vector<4x8xf32>
    %82 = arith.addf %79, %81 : vector<4x8xf32>
    %83 = vector.broadcast %22 : vector<1x8xf32> to vector<4x8xf32>
    %84 = arith.addf %82, %83 : vector<4x8xf32>
    %85 = arith.truncf %84 : vector<4x8xf32> to vector<4x8xbf16>
    %c0_58 = arith.constant 0 : index
    %c0_59 = arith.constant 0 : index
    %c4_60 = arith.constant 4 : index
    %c0_61 = arith.constant 0 : index
    %86 = vector.load %arg6[%c0_58, %c0_59, %c4_60, %c0_61] : memref<1x4x8x8xbf16, #tpu.memory_space<vmem>>, vector<1x4x1x8xbf16>
    %87 = vector.shape_cast %86 : vector<1x4x1x8xbf16> to vector<4x8xbf16>
    %88 = vector.shape_cast %85 : vector<4x8xbf16> to vector<1x4x1x8xbf16>
    tpu.vector_store %arg6[%c0_58, %c0_59, %c4_60, %c0_61], %88 {strides = array<i32>} : memref<1x4x8x8xbf16, #tpu.memory_space<vmem>>, vector<1x4x1x8xbf16>,
    %89 = vector.extract_strided_slice %15 {offsets = [0, 32], sizes = [1, 8], strides = [1, 1]} : vector<1x64xf32> to vector<1x8xf32>
    %c0_62 = arith.constant 0 : index
    %c4_63 = arith.constant 4 : index
    %c0_64 = arith.constant 0 : index
    %90 = vector.load %arg7[%c0_62, %c4_63, %c0_64] : memref<1x8x8xf32, #tpu.memory_space<vmem>>, vector<1x1x8xf32>
    %91 = vector.shape_cast %90 : vector<1x1x8xf32> to vector<1x8xf32>
    %92 = vector.shape_cast %89 : vector<1x8xf32> to vector<1x1x8xf32>
    tpu.vector_store %arg7[%c0_62, %c4_63, %c0_64], %92 {strides = array<i32>} : memref<1x8x8xf32, #tpu.memory_space<vmem>>, vector<1x1x8xf32>,
    %93 = vector.extract_strided_slice %11 {offsets = [0, 40], sizes = [4, 8], strides = [1, 1]} : vector<4x64xf32> to vector<4x8xf32>
    %c0_65 = arith.constant 0 : index
    %c0_66 = arith.constant 0 : index
    %c5 = arith.constant 5 : index
    %c0_67 = arith.constant 0 : index
    %94 = vector.load %arg3[%c0_65, %c0_66, %c5, %c0_67] : memref<1x4x8x8xf32, #tpu.memory_space<vmem>>, vector<1x4x1x8xf32>
    %95 = vector.shape_cast %94 : vector<1x4x1x8xf32> to vector<4x8xf32>
    %96 = arith.addf %93, %95 : vector<4x8xf32>
    %97 = vector.broadcast %22 : vector<1x8xf32> to vector<4x8xf32>
    %98 = arith.addf %96, %97 : vector<4x8xf32>
    %99 = arith.truncf %98 : vector<4x8xf32> to vector<4x8xbf16>
    %c0_68 = arith.constant 0 : index
    %c0_69 = arith.constant 0 : index
    %c5_70 = arith.constant 5 : index
    %c0_71 = arith.constant 0 : index
    %100 = vector.load %arg6[%c0_68, %c0_69, %c5_70, %c0_71] : memref<1x4x8x8xbf16, #tpu.memory_space<vmem>>, vector<1x4x1x8xbf16>
    %101 = vector.shape_cast %100 : vector<1x4x1x8xbf16> to vector<4x8xbf16>
    %102 = vector.shape_cast %99 : vector<4x8xbf16> to vector<1x4x1x8xbf16>
    tpu.vector_store %arg6[%c0_68, %c0_69, %c5_70, %c0_71], %102 {strides = array<i32>} : memref<1x4x8x8xbf16, #tpu.memory_space<vmem>>, vector<1x4x1x8xbf16>,
    %103 = vector.extract_strided_slice %15 {offsets = [0, 40], sizes = [1, 8], strides = [1, 1]} : vector<1x64xf32> to vector<1x8xf32>
    %c0_72 = arith.constant 0 : index
    %c5_73 = arith.constant 5 : index
    %c0_74 = arith.constant 0 : index
    %104 = vector.load %arg7[%c0_72, %c5_73, %c0_74] : memref<1x8x8xf32, #tpu.memory_space<vmem>>, vector<1x1x8xf32>
    %105 = vector.shape_cast %104 : vector<1x1x8xf32> to vector<1x8xf32>
    %106 = vector.shape_cast %103 : vector<1x8xf32> to vector<1x1x8xf32>
    tpu.vector_store %arg7[%c0_72, %c5_73, %c0_74], %106 {strides = array<i32>} : memref<1x8x8xf32, #tpu.memory_space<vmem>>, vector<1x1x8xf32>,
    %107 = vector.extract_strided_slice %11 {offsets = [0, 48], sizes = [4, 8], strides = [1, 1]} : vector<4x64xf32> to vector<4x8xf32>
    %c0_75 = arith.constant 0 : index
    %c0_76 = arith.constant 0 : index
    %c6 = arith.constant 6 : index
    %c0_77 = arith.constant 0 : index
    %108 = vector.load %arg3[%c0_75, %c0_76, %c6, %c0_77] : memref<1x4x8x8xf32, #tpu.memory_space<vmem>>, vector<1x4x1x8xf32>
    %109 = vector.shape_cast %108 : vector<1x4x1x8xf32> to vector<4x8xf32>
    %110 = arith.addf %107, %109 : vector<4x8xf32>
    %111 = vector.broadcast %22 : vector<1x8xf32> to vector<4x8xf32>
    %112 = arith.addf %110, %111 : vector<4x8xf32>
    %113 = arith.truncf %112 : vector<4x8xf32> to vector<4x8xbf16>
    %c0_78 = arith.constant 0 : index
    %c0_79 = arith.constant 0 : index
    %c6_80 = arith.constant 6 : index
    %c0_81 = arith.constant 0 : index
    %114 = vector.load %arg6[%c0_78, %c0_79, %c6_80, %c0_81] : memref<1x4x8x8xbf16, #tpu.memory_space<vmem>>, vector<1x4x1x8xbf16>
    %115 = vector.shape_cast %114 : vector<1x4x1x8xbf16> to vector<4x8xbf16>
    %116 = vector.shape_cast %113 : vector<4x8xbf16> to vector<1x4x1x8xbf16>
    tpu.vector_store %arg6[%c0_78, %c0_79, %c6_80, %c0_81], %116 {strides = array<i32>} : memref<1x4x8x8xbf16, #tpu.memory_space<vmem>>, vector<1x4x1x8xbf16>,
    %117 = vector.extract_strided_slice %15 {offsets = [0, 48], sizes = [1, 8], strides = [1, 1]} : vector<1x64xf32> to vector<1x8xf32>
    %c0_82 = arith.constant 0 : index
    %c6_83 = arith.constant 6 : index
    %c0_84 = arith.constant 0 : index
    %118 = vector.load %arg7[%c0_82, %c6_83, %c0_84] : memref<1x8x8xf32, #tpu.memory_space<vmem>>, vector<1x1x8xf32>
    %119 = vector.shape_cast %118 : vector<1x1x8xf32> to vector<1x8xf32>
    %120 = vector.shape_cast %117 : vector<1x8xf32> to vector<1x1x8xf32>
    tpu.vector_store %arg7[%c0_82, %c6_83, %c0_84], %120 {strides = array<i32>} : memref<1x8x8xf32, #tpu.memory_space<vmem>>, vector<1x1x8xf32>,
    %121 = vector.extract_strided_slice %11 {offsets = [0, 56], sizes = [4, 8], strides = [1, 1]} : vector<4x64xf32> to vector<4x8xf32>
    %c0_85 = arith.constant 0 : index
    %c0_86 = arith.constant 0 : index
    %c7 = arith.constant 7 : index
    %c0_87 = arith.constant 0 : index
    %122 = vector.load %arg3[%c0_85, %c0_86, %c7, %c0_87] : memref<1x4x8x8xf32, #tpu.memory_space<vmem>>, vector<1x4x1x8xf32>
    %123 = vector.shape_cast %122 : vector<1x4x1x8xf32> to vector<4x8xf32>
    %124 = arith.addf %121, %123 : vector<4x8xf32>
    %125 = vector.broadcast %22 : vector<1x8xf32> to vector<4x8xf32>
    %126 = arith.addf %124, %125 : vector<4x8xf32>
    %127 = arith.truncf %126 : vector<4x8xf32> to vector<4x8xbf16>
    %c0_88 = arith.constant 0 : index
    %c0_89 = arith.constant 0 : index
    %c7_90 = arith.constant 7 : index
    %c0_91 = arith.constant 0 : index
    %128 = vector.load %arg6[%c0_88, %c0_89, %c7_90, %c0_91] : memref<1x4x8x8xbf16, #tpu.memory_space<vmem>>, vector<1x4x1x8xbf16>
    %129 = vector.shape_cast %128 : vector<1x4x1x8xbf16> to vector<4x8xbf16>
    %130 = vector.shape_cast %127 : vector<4x8xbf16> to vector<1x4x1x8xbf16>
    tpu.vector_store %arg6[%c0_88, %c0_89, %c7_90, %c0_91], %130 {strides = array<i32>} : memref<1x4x8x8xbf16, #tpu.memory_space<vmem>>, vector<1x4x1x8xbf16>,
    %131 = vector.extract_strided_slice %15 {offsets = [0, 56], sizes = [1, 8], strides = [1, 1]} : vector<1x64xf32> to vector<1x8xf32>
    %c0_92 = arith.constant 0 : index
    %c7_93 = arith.constant 7 : index
    %c0_94 = arith.constant 0 : index
    %132 = vector.load %arg7[%c0_92, %c7_93, %c0_94] : memref<1x8x8xf32, #tpu.memory_space<vmem>>, vector<1x1x8xf32>
    %133 = vector.shape_cast %132 : vector<1x1x8xf32> to vector<1x8xf32>
    %134 = vector.shape_cast %131 : vector<1x8xf32> to vector<1x1x8xf32>
    tpu.vector_store %arg7[%c0_92, %c7_93, %c0_94], %134 {strides = array<i32>} : memref<1x8x8xf32, #tpu.memory_space<vmem>>, vector<1x1x8xf32>,
    return
  }
  func.func @transform_0(%arg0: i32, %arg1: i32) -> (i32, i32, i32, i32) {
    %c0_i32 = arith.constant 0 : i32
    %c0_i32_0 = arith.constant 0 : i32
    %c0_i32_1 = arith.constant 0 : i32
    return %arg0, %arg1, %c0_i32, %c0_i32_0 : i32, i32, i32, i32
  }
  func.func @transform_1(%arg0: i32, %arg1: i32) -> (i32, i32, i32, i32) {
    %c0_i32 = arith.constant 0 : i32
    %c0_i32_0 = arith.constant 0 : i32
    %c0_i32_1 = arith.constant 0 : i32
    return %arg0, %c0_i32, %arg1, %c0_i32_0 : i32, i32, i32, i32
  }
  func.func @transform_2(%arg0: i32, %arg1: i32) -> (i32, i32, i32) {
    %c0_i32 = arith.constant 0 : i32
    %c0_i32_0 = arith.constant 0 : i32
    %c0_i32_1 = arith.constant 0 : i32
    return %arg0, %c0_i32, %c0_i32_0 : i32, i32, i32
  }
  func.func @transform_3(%arg0: i32, %arg1: i32) -> (i32, i32) {
    %c0_i32 = arith.constant 0 : i32
    %c0_i32_0 = arith.constant 0 : i32
    %c0_i32_1 = arith.constant 0 : i32
    return %c0_i32, %c0_i32_0 : i32, i32
  }
  func.func @transform_4(%arg0: i32, %arg1: i32) -> (i32, i32, i32, i32) {
    %c0_i32 = arith.constant 0 : i32
    %c0_i32_0 = arith.constant 0 : i32
    %c0_i32_1 = arith.constant 0 : i32
    return %arg0, %c0_i32, %arg1, %c0_i32_0 : i32, i32, i32, i32
  }
  func.func @transform_5(%arg0: i32, %arg1: i32) -> (i32, i32, i32) {
    %c0_i32 = arith.constant 0 : i32
    %c0_i32_0 = arith.constant 0 : i32
    return %arg0, %arg1, %c0_i32 : i32, i32, i32
  }
}

</mosaic_0001>

<bundles_post_ra>
// kernel: tpu_custom_call.1
= control target key start
LH: loop header
LB: loop body
LE: loop exit
PB: predicated region body
PF: predicated region fallthrough
CT: control target
= control target key end

     0   :  { %s2789_s0 = inlined_call_operand.hbm [shape: f32[2,8,8,16], index: 0, kind: input, shape index: {}]   ;;  %s2790_s1 = inlined_call_operand.hbm [shape: f32[2,4,8,8], index: 1, kind: input, shape index: {}]   ;;  %s2791_s2 = inlined_call_operand.vmem [shape: f32[2,1,8], index: 2, kind: input, shape index: {}]   ;;  %s2792_s3 = inlined_call_operand.vmem [shape: bf16[4,16], index: 3, kind: input, shape index: {}]   ;;  %s2793_s4 = inlined_call_operand.hbm [shape: bf16[2,4,8,8], index: 4, kind: output, shape index: {0}]   ;;  %s2794_s5 = inlined_call_operand.hbm [shape: f32[2,8,8], index: 5, kind: output, shape index: {1}]  }
   0x1   :  { %2798 = sst [smem:[#allocation14_spill]] %s2789_s0 }
   0x2   :  { %11 = vsyncpa [#allocation3], 0 }
   0x3   :  { %13 = vsyncpa [#allocation3 + $0x1], 0 }
   0x4   :  { %14 = vsyncpa [#allocation6], 0 }
   0x5   :  { %16 = vsyncpa [#allocation6 + $0x1], 0 }
   0x6   :  { %17 = vsyncpa [#allocation4], 0 }
   0x7   :  { %19 = vsyncpa [#allocation4 + $0x1], 0 }
   0x8   :  { %20 = vsyncpa [#allocation9], 0 }
   0x9   :  { %22 = vsyncpa [#allocation9 + $0x1], 0  ;;  %s1982_s18 = smov 0   ;;  %s1984_s19 = smov 0  }
   0xa   :  { %s1986_s20 = smov 0   ;;  %s1988_s21 = smov 0  }
   0xb   :  { %s1990_s22 = smov 0   ;;  %s1992_s23 = smov 0  }
   0xc LB: > { %s1553_s24 = sadd.s32 4294967295, %s1924_s23   ;;  %s1554_s25 = sadd.s32 4294967294, %s1924_s23   ;;  %s1924_s23 = sphi %s1992_s23, %s28_s23   ;;  %s1920_s22 = sphi %s1990_s22, %s2832_s22   ;;  %s1916_s21 = sphi %s1988_s21, %s2831_s21   ;;  %s1912_s20 = sphi %s1986_s20, %s2830_s20   ;;  %s1908_s19 = sphi %s1984_s19, %s2829_s19   ;;  %s1904_s18 = sphi %s1982_s18, %s2828_s18  }
   0xd   : > { %s40_s26 = sadd.s32 1, %s1920_s22  ;;  %s49_s27 = sadd.s32 1, %s1912_s20 }
   0xe   : > { %p42_p0 = scmp.ge.s32.totalorder %s40_s26, 2  ;;  %p56_p1 = scmp.ne.s32.totalorder %s1912_s20, %s1908_s19 }
   0xf   : > { %p57_p2 = scmp.eq.s32.totalorder %s1924_s23, 0  ;;  %p62_p3 = scmp.ne.s32.totalorder %s1908_s19, %s1904_s18 }
  0x10   : > { %s2834_s26 = smov (%p42_p0, %s40_s26), 0  ;;  %p63_p5 = scmp.eq.s32.totalorder %s1553_s24, 0 }
  0x11   : > { %p2023_p4 = por %p57_p2, %p56_p1  ;;  %s44_s29 = ssub.s32 %s1920_s22, %s2834_s26 }
  0x12   : > { %p163_p6 = scmp.eq.s32.totalorder %s1553_s24, 1  ;;  %p47_p7 = scmp.eq.s32.totalorder %s44_s29, 0 }
  0x13   : > { %p2029_p8 = por %p63_p5, %p62_p3  ;;  %p169_p10 = scmp.eq.s32.totalorder %s1554_s25, 1 }
  0x14   : > { %p2033_p9 = por %p163_p6, %p56_p1  ;;  %p1642_p13 = scmp.lt.s32.totalorder %s1924_s23, 2 }
  0x15   : > { %s2800_s30 = scalar_select %p2029_p8, 1, 0 }
  0x16   : > { %s2801_s6 = scalar_select %p2033_p9, 1, 0 }
  0x17   : > { %s2038_s7 = scalar_select %p47_p7, %s1912_s20, %s49_s27  }
  0x18   : > { %p2040_p11 = por %p169_p10, %p62_p3  ;;  %s2047_s9 = sand.u32 1, %s1912_s20  }
  0x19   : > { %s1557_s10 = sshll.u32 %s2047_s9, 6  ;;  %s1600_s11 = sshll.u32 %s1920_s22, 10 }
  0x1a   : > { %s2802_s8 = scalar_select %p2040_p11, 1, 0 }
  0x1b   : > { %s2803_s0 = sld [smem:[#allocation14_spill]]  ;;  %s224_s15 = scalar_lea.vmem [#allocation2], %s1557_s10 }
  0x1c   : > { %s233_s16 = sshll.u32 %s224_s15, 4  ;;  %p2060_p0 = pnand %p1642_p13, %p2023_p4  ;;  %s2056_s16 = int_to_ptr.vmem [resolvable:$true] %s233_s16 }
  0x1d   : > { %s221_s24 = scalar_lea.sflag [#allocation3], %s2047_s9 }
  0x1e   : > { %p1748_p3 = pneg %p2060_p0 }
  0x21   : > { %s2054_s14 = scalar_lea.hbm %s2803_s0, %s1600_s11  ;;  %s1751_s28 = scalar_lea.hbm %s2803_s0, 2048 }
  0x22   : > { %s1746_s25 = scalar_lea.hbm %s2054_s14, 1024  ;;  %p1752_p4 = scmp.lt.u32.totalorder %s2054_s14, %s2803_s0 }
  0x23   : > { %p1747_p2 = scmp.ne.s32.totalorder %s2054_s14, %s1746_s25  ;;  %p1753_p7 = scmp.lt.u32.totalorder %s1751_s28, %s1746_s25 }
  0x24   : > { %p1755_p13 = scmp.lt.u32.totalorder %s1746_s25, %s2054_s14 }
  0x25   : > { %p1749_p5 = pnand %p1748_p3, %p1747_p2  ;;  %p1754_p10 = por %p1753_p7, %p1752_p4 }
  0x27   : > { %p1750_p6 = pneg %p1749_p5  ;;  %p1756_p12 = por %p1755_p13, %p1754_p10 }
  0x29   : > { %p1757_p1 = pnand %p1756_p12, %p1750_p6 }
  0x2b   : > { %1760 = shalt.err (!%p1757_p1)
}
  0x2c   : > { %s1761_s12 = scalar_lea.vmem %s2056_s16, 1024  ;;  %s1926_s13 = smov [#allocation2]  }
  0x2d   : > { %p1762_p2 = scmp.ne.s32.totalorder %s2056_s16, %s1761_s12  ;;  %s1766_s15 = sshll.u32 %s1926_s13, 4  ;;  %s1767_s15 = int_to_ptr.vmem [resolvable:$false] %s1766_s15 }
  0x2e   : > { %s1768_s27 = scalar_lea.vmem %s1767_s15, 2048  ;;  %p1769_p9 = scmp.lt.s32.totalorder %s2056_s16, %s1767_s15 }
  0x2f   : > { %p1764_p5 = pnand %p1762_p2, %p1748_p3  ;;  %p1770_p4 = scmp.lt.s32.totalorder %s1768_s27, %s1761_s12 }
  0x31   : > { %p1765_p11 = pneg %p1764_p5  ;;  %p1771_p7 = por %p1770_p4, %p1769_p9 }
  0x33   : > { %p1772_p10 = pnand %p1771_p7, %p1765_p11 }
  0x35   : > { %1775 = shalt.err (!%p1772_p10)
}
  0x36   : > { %s2796_s25 = smov 128   ;;  %s1928_s29 = smov 8  }
  0x37   : > { %1631 = dma.hbm_to_vmem [thread:$0]  (!%p2060_p0), %s2054_s14, 1024, %s2056_s16, %s221_s24, %s2796_s25, %s2796_s25, %s1928_s29  }
  0x38   : > { %p269_p9 = scmp.lt.s32.totalorder %s1924_s23, 3  ;;  %s1560_s28 = sshll.u32 %s2047_s9, 5 }
  0x39   : > { %s1601_s10 = sshll.u32 %s1920_s22, 9  ;;  %p2805_p11 = scmp.ge.s32.totalorder %s1924_s23, 1 }
  0x3a   : > { %s2108_s15 = scalar_lea.hbm %s2790_s1, %s1601_s10  ;;  %s247_s27 = scalar_lea.vmem [#allocation5], %s1560_s28 }
  0x3b   : > { %p2101_p12 = pnand %p2805_p11, %p269_p9  ;;  %s255_s0 = sshll.u32 %s247_s27, 4  ;;  %s2110_s0 = int_to_ptr.vmem [resolvable:$true] %s255_s0 }
  0x3c   : > { %s244_s14 = scalar_lea.sflag [#allocation6], %s2047_s9  ;;  %s1776_s16 = scalar_lea.hbm %s2108_s15, 512 }
  0x3d   : > { %p1777_p1 = scmp.ne.s32.totalorder %s2108_s15, %s1776_s16  ;;  %s1781_s10 = scalar_lea.hbm %s2790_s1, 1024 }
  0x3e   : > { %p1782_p2 = scmp.lt.u32.totalorder %s2108_s15, %s2790_s1  ;;  %p1783_p5 = scmp.lt.u32.totalorder %s1781_s10, %s1776_s16 }
  0x3f   : > { %p1779_p6 = pnand %p1777_p1, %p1748_p3  ;;  %p1785_p7 = scmp.lt.u32.totalorder %s1776_s16, %s2108_s15 }
  0x40   : > { %p1784_p4 = por %p1783_p5, %p1782_p2 }
  0x41   : > { %p1780_p13 = pneg %p1779_p6 }
  0x42   : > { %p1786_p10 = por %p1785_p7, %p1784_p4 }
  0x44   : > { %p1787_p9 = pnand %p1786_p10, %p1780_p13 }
  0x46   : > { %1790 = shalt.err (!%p1787_p9)
}
  0x47   : > { %s1791_s28 = scalar_lea.vmem %s2110_s0, 512  ;;  %s1929_s25 = smov [#allocation5]  }
  0x48   : > { %p1792_p11 = scmp.ne.s32.totalorder %s2110_s0, %s1791_s28  ;;  %s1796_s27 = sshll.u32 %s1929_s25, 4  ;;  %s1797_s27 = int_to_ptr.vmem [resolvable:$false] %s1796_s27 }
  0x49   : > { %s1798_s24 = scalar_lea.vmem %s1797_s27, 1024  ;;  %p1799_p8 = scmp.lt.s32.totalorder %s2110_s0, %s1797_s27 }
  0x4a   : > { %p1794_p1 = pnand %p1792_p11, %p1748_p3  ;;  %p1800_p2 = scmp.lt.s32.totalorder %s1798_s24, %s1791_s28 }
  0x4c   : > { %p1795_p6 = pneg %p1794_p1  ;;  %p1801_p5 = por %p1800_p2, %p1799_p8 }
  0x4e   : > { %p1802_p4 = pnand %p1801_p5, %p1795_p6 }
  0x50   : > { %1805 = shalt.err (!%p1802_p4)
}
  0x51   : > { %s2807_s16 = smov 128   ;;  %273 = sbr.rel (%p2101_p12) target bundleno = 609 (0x261), region = 36 }
  0x52   : > { %1634 = dma.hbm_to_vmem [thread:$0]  (!%p2060_p0), %s2108_s15, 512, %s2110_s0, %s244_s14, %s2807_s16, %s2807_s16, %s1928_s29  }
  0x53   : > { %s2144_s10 = sand.u32 (!%p2101_p12), 1, %s1908_s19   ;;  %p2808_p8 = scmp.ne.s32.totalorder (!%p2101_p12), %s2800_s30, 0 }
  0x54   : > { %s1564_s12 = sshll.u32 (!%p2101_p12), %s2144_s10, 6  ;;  %s276_s13 = scalar_lea.sflag (!%p2101_p12), [#allocation3], %s2144_s10 }
  0x55   : > { %s2148_s17 = scalar_lea.vmem (!%p2101_p12), [#allocation2], %s1564_s12 }
  0x58   : > { %1887 = dma.done.wait (%p2808_p8), %s276_s13, 1024  }
  0x59   : > { %1889 = vsyncadd (%p2808_p8), %s276_s13, 4294966272  ;;  %s1565_s0 = sshll.u32 %s2144_s10, 5  ;;  %s285_s9 = scalar_lea.sflag [#allocation6], %s2144_s10 }
  0x5a   : > { %s2156_s29 = scalar_lea.vmem [#allocation5], %s1565_s0 }
  0x5b   : > { %1891 = dma.done.wait (%p2808_p8), %s285_s9, 512  }
  0x5c   : > { %1893 = vsyncadd (%p2808_p8), %s285_s9, 4294966784  ;;  %p329_p0 = scmp.lt.s32.totalorder %s1916_s21, 1  ;;  %v491_v0 = vlaneseq  ;;  %v1930_v1 = vmov 0.0   ;;  %vm1931_vm0 = vmmov 0   ;;  %v2173_v5 = vld [vmem:[%s2148_s17] sm:$0xff]  ;;  %v2176_v6 = vld [vmem:[%s2148_s17 + $0x8] sm:$0xff] }
  0x5d   : > { %1608 = vmatprep.subr.bf16.mxu0 %v1930_v1  ;;  %1616 = vmatprep.mubr.msk.bf16.mxu0 %vm1931_vm0, %v1930_v1  ;;  %vm480_vm1 = vcmask 1041409   ;;  %v1568_v7 = vmul.f32 -1.442695, %v2173_v5  ;;  %v1569_v8 = vmul.f32 -1.442695, %v2176_v6  ;;  %v2181_v9 = vld [vmem:[%s2148_s17 + $0x10] sm:$0xff] }
  0x5e   : > { %s330_s11 = scalar_select %p329_p0, %s1916_s21, 1  ;;  %v2165_v2 = vshrl.u32 %v491_v0, 7  ;;  %v2185_v11 = vld [vmem:[%s2148_s17 + $0x18] sm:$0xff]  ;;  %v1570_v12 = vmul.f32 -1.442695, %v2181_v9  ;;  %v2189_v13 = vld [vmem:[%s2148_s17 + $0x20] sm:$0xff] }
  0x5f   : > { %1714 = vpow2.f32 %v1568_v7  ;;  %v1571_v15 = vmul.f32 -1.442695, %v2185_v11  ;;  %v2195_v16 = vld [vmem:[%s2148_s17 + $0x28] sm:$0xff]  ;;  %v1572_v17 = vmul.f32 -1.442695, %v2189_v13  ;;  %v2199_v18 = vld [vmem:[%s2148_s17 + $0x30] sm:$0xff] }
  0x60   : > { %s331_s14 = scalar_lea.vmem %s2791_s2, %s330_s11  ;;  %v493_v3 = vsub.s32 0, %v2165_v2  ;;  %1716 = vpow2.f32 %v1569_v8  ;;  %v1573_v19 = vmul.f32 -1.442695, %v2195_v16  ;;  %v2203_v20 = vld [vmem:[%s2148_s17 + $0x38] sm:$0xff]  ;;  %vm483_vm3 = vcmask 1042434   ;;  %s1932_s28 = smov 32  }
  0x61   : > { %v468_v4 = vld [vmem:[%s331_s14] sm:$0x1]  ;;  %vm486_vm4 = vcmask 1043459   ;;  %1718 = vpow2.f32 %v1570_v12  ;;  %v1574_v21 = vmul.f32 -1.442695, %v2199_v18  ;;  %s1933_s25 = smov 16  }
  0x62   : > { %vm469_vm2 = vcmp.gt.f32.partialorder %v468_v4, 0.0  ;;  %v1575_v22 = vmul.f32 -1.442695, %v2203_v20  ;;  %v691_v23 = vld [vmem:[%s2156_s29 + $0x2] sm:$0x1]  ;;  %1720 = vpow2.f32 %v1571_v15  ;;  %s1934_s27 = smov 48  }
  0x63   : > { %v470_v10 = vsel %vm469_vm2, -1e+09, %v1930_v1  ;;  %v692_v24 = vld [vmem:[%s2156_s29 + $0xa] sm:$0x1]  ;;  %v693_v25 = vld [vmem:[%s2156_s29 + $0x12] sm:$0x1]  ;;  %1722 = vpow2.f32 %v1572_v17 }
  0x64   : > { %v2191_v14 = vrot.slane %v470_v10, %v493_v3  ;;  %v694_v26 = vld [vmem:[%s2156_s29 + $0x1a] sm:$0x1]  ;;  %v699_v27 = vrot.slane %v692_v24, 7  ;;  %v701_v28 = vrot.slane %v693_v25, 6  ;;  %v916_v30 = vld [vmem:[%s2156_s29 + $0x4] sm:$0x1]  ;;  %1724 = vpow2.f32 %v1573_v19 }
  0x65   : > { %v703_v29 = vrot.slane %v694_v26, 5  ;;  %v917_v31 = vld [vmem:[%s2156_s29 + $0xc] sm:$0x1]  ;;  %v918_v32 = vld [vmem:[%s2156_s29 + $0x14] sm:$0x1]  ;;  %1726 = vpow2.f32 %v1574_v21  ;;  %s1935_s24 = smov 24  }
  0x66   : > { %934 = vrot.lane.b32.xlu0 %v2191_v14, %s1932_s28  ;;  %709 = vrot.lane.b32.xlu1 %v2191_v14, %s1933_s25  ;;  %v919_v33 = vld [vmem:[%s2156_s29 + $0x1c] sm:$0x1]  ;;  %v700_v34 = vsel %vm480_vm1, %v699_v27, %v691_v23  ;;  %v924_v35 = vrot.slane %v917_v31, 7  ;;  %v926_v36 = vrot.slane %v918_v32, 6  ;;  %v1141_v37 = vld [vmem:[%s2156_s29 + $0x6] sm:$0x1]  ;;  %1728 = vpow2.f32 %v1575_v22 }
  0x67   : > { %v1142_v38 = vld [vmem:[%s2156_s29 + $0xe] sm:$0x1]  ;;  %v702_v39 = vsel %vm483_vm3, %v701_v28, %v700_v34  ;;  %v928_v40 = vrot.slane %v919_v33, 5  ;;  %v1143_v41 = vld [vmem:[%s2156_s29 + $0x16] sm:$0x1]  ;;  %s1936_s16 = smov 8  }
  0x68   : > { %v1144_v42 = vld [vmem:[%s2156_s29 + $0x1e] sm:$0x1]  ;;  %v1149_v43 = vrot.slane %v1142_v38, 7  ;;  %v704_v44 = vsel %vm486_vm4, %v703_v29, %v702_v39  ;;  %v925_v45 = vsel %vm480_vm1, %v924_v35, %v916_v30  ;;  %v1151_v46 = vrot.slane %v1143_v41, 6  ;;  %v578_v48 = vld [vmem:[%s2156_s29 + $0x1] sm:$0x1] }
  0x69   : > { %v1153_v47 = vrot.slane %v1144_v42, 5  ;;  %v579_v49 = vld [vmem:[%s2156_s29 + $0x9] sm:$0x1]  ;;  %v927_v50 = vsel %vm483_vm3, %v926_v36, %v925_v45  ;;  %v580_v52 = vld [vmem:[%s2156_s29 + $0x11] sm:$0x1]  ;;  %v1715_v55 = vpop.eup %1714  ;;  %s1937_s12 = smov 40  }
  0x6a   : > { %1159 = vrot.lane.b32.xlu1 %v2191_v14, %s1934_s27  ;;  %705 = vrot.lane.b32.xlu0 %v704_v44, %s1933_s25  ;;  %v1150_v51 = vsel %vm480_vm1, %v1149_v43, %v1141_v37  ;;  %v581_v53 = vld [vmem:[%s2156_s29 + $0x19] sm:$0x1]  ;;  %v586_v54 = vrot.slane %v579_v49, 7  ;;  %v929_v56 = vsel %vm486_vm4, %v928_v40, %v927_v50  ;;  %v588_v58 = vrot.slane %v580_v52, 6  ;;  %v804_v60 = vld [vmem:[%s2156_s29 + $0x3] sm:$0x1]  ;;  %v1717_v62 = vpop.eup %1716 }
  0x6b   : > { %v1152_v57 = vsel %vm483_vm3, %v1151_v46, %v1150_v51  ;;  %v590_v59 = vrot.slane %v581_v53, 5  ;;  %v805_v61 = vld [vmem:[%s2156_s29 + $0xb] sm:$0x1]  ;;  %v365_v63 = vadd.f32 1.0, %v1715_v55  ;;  %v806_v4 = vld [vmem:[%s2156_s29 + $0x13] sm:$0x1]  ;;  %v1719_v10 = vpop.eup %1718 }
  0x6c   : > { %v1154_v0 = vsel %vm486_vm4, %v1153_v47, %v1152_v57  ;;  %v587_v3 = vsel %vm480_vm1, %v586_v54, %v578_v48  ;;  %v807_v7 = vld [vmem:[%s2156_s29 + $0x1b] sm:$0x1]  ;;  %v812_v8 = vrot.slane %v805_v61, 7  ;;  %v366_v12 = vadd.f32 1.0, %v1717_v62  ;;  %v1029_v21 = vld [vmem:[%s2156_s29 + $0x5] sm:$0x1]  ;;  %v1721_v22 = vpop.eup %1720 }
  0x6d   : > { %v589_v15 = vsel %vm483_vm3, %v588_v58, %v587_v3  ;;  %v814_v17 = vrot.slane %v806_v4, 6  ;;  %v816_v19 = vrot.slane %v807_v7, 5  ;;  %1730 = vrcp.f32 %v365_v63  ;;  %v1030_v26 = vld [vmem:[%s2156_s29 + $0xd] sm:$0x1]  ;;  %v1031_v27 = vld [vmem:[%s2156_s29 + $0x15] sm:$0x1]  ;;  %v1723_v28 = vpop.eup %1722 }
  0x6e   : > { %1155 = vrot.lane.b32.xlu1 %v1154_v0, %s1934_s27  ;;  %v367_v23 = vadd.f32 1.0, %v1719_v10  ;;  %930 = vrot.lane.b32.xlu0 %v929_v56, %s1932_s28  ;;  %v591_v24 = vsel %vm486_vm4, %v590_v59, %v589_v15  ;;  %v813_v25 = vsel %vm480_vm1, %v812_v8, %v804_v60  ;;  %1732 = vrcp.f32 %v366_v12  ;;  %v1032_v31 = vld [vmem:[%s2156_s29 + $0x1d] sm:$0x1]  ;;  %v1725_v33 = vpop.eup %1724  ;;  %v1255_v36 = vld [vmem:[%s2156_s29 + $0xf] sm:$0x1]  ;;  %s1938_s13 = smov 56  }
  0x6f   : > { %v368_v29 = vadd.f32 1.0, %v1721_v22  ;;  %v815_v30 = vsel %vm483_vm3, %v814_v17, %v813_v25  ;;  %v1037_v32 = vrot.slane %v1030_v26, 7  ;;  %v1039_v35 = vrot.slane %v1031_v27, 6  ;;  %v1256_v37 = vld [vmem:[%s2156_s29 + $0x17] sm:$0x1]  ;;  %v1727_v42 = vpop.eup %1726  ;;  %s1567_s9 = sshll.u32 %s2144_s10, 3 }
  0x70   : > { %1734 = vrcp.f32 %v367_v23  ;;  %v817_v34 = vsel %vm486_vm4, %v816_v19, %v815_v30  ;;  %v1041_v39 = vrot.slane %v1032_v31, 5  ;;  %v1254_v40 = vld [vmem:[%s2156_s29 + $0x7] sm:$0x1]  ;;  %v1257_v41 = vld [vmem:[%s2156_s29 + $0x1f] sm:$0x1]  ;;  %v369_v43 = vadd.f32 1.0, %v1723_v28  ;;  %v1729_v49 = vpop.eup %1728 }
  0x71   : > { %1736 = vrcp.f32 %v368_v29  ;;  %v1038_v38 = vsel %vm480_vm1, %v1037_v32, %v1029_v21  ;;  %v1262_v45 = vrot.slane %v1255_v36, 7  ;;  %v370_v46 = vadd.f32 1.0, %v1725_v33  ;;  %v472_v27 = vld [vmem:[%s2156_s29 + $0x8] sm:$0x1]  ;;  %v473_v30 = vld [vmem:[%s2156_s29 + $0x10] sm:$0x1] }
  0x72   : > { %818 = vrot.lane.b32.xlu1 %v817_v34, %s1935_s24  ;;  %592 = vrot.lane.b32.xlu0 %v591_v24, %s1936_s16  ;;  %v1040_v44 = vsel %vm483_vm3, %v1039_v35, %v1038_v38  ;;  %v1264_v48 = vrot.slane %v1256_v37, 6  ;;  %v1266_v51 = vrot.slane %v1257_v41, 5  ;;  %1738 = vrcp.f32 %v369_v43  ;;  %v471_v32 = vld [vmem:[%s2156_s29] sm:$0x1]  ;;  %v474_v33 = vld [vmem:[%s2156_s29 + $0x18] sm:$0x1] }
  0x73   : > { %v1042_v47 = vsel %vm486_vm4, %v1041_v39, %v1040_v44  ;;  %v1263_v50 = vsel %vm480_vm1, %v1262_v45, %v1254_v40  ;;  %1740 = vrcp.f32 %v370_v46  ;;  %v371_v59 = vadd.f32 1.0, %v1727_v42  ;;  %s1941_s29 = smov 112   ;;  %s1942_s11 = smov 120  }
  0x74   : > { %v1265_v52 = vsel %vm483_vm3, %v1264_v48, %v1263_v50  ;;  %vm402_vm5 = vcmask 130048   ;;  %v372_v61 = vadd.f32 1.0, %v1729_v49  ;;  %v479_v31 = vrot.slane %v472_v27, 7  ;;  %s2357_s30 = scalar_lea.vmem [#allocation8], %s1567_s9  ;;  %s1943_s15 = smov 96  }
  0x75   : > { %v1267_v53 = vsel %vm486_vm4, %v1266_v51, %v1265_v52  ;;  %1742 = vrcp.f32 %v371_v59  ;;  %v482_v34 = vrot.slane %v473_v30, 6  ;;  %v1939_v35 = vmov 1966171168   ;;  %s1944_s14 = smov 104   ;;  %s1945_s28 = smov 88  }
  0x76   : > { %1043 = vrot.lane.b32.xlu0 %v1042_v47, %s1937_s12  ;;  %1268 = vrot.lane.b32.xlu1 %v1267_v53, %s1938_s13  ;;  %1744 = vrcp.f32 %v372_v61  ;;  %v500_v36 = vunpack.c.l.s4 %v1939_v35  ;;  %v1940_v37 = vmov 286326784   ;;  %v481_v39 = vsel %vm480_vm1, %v479_v31, %v471_v32  ;;  %s1946_s25 = smov 80   ;;  %s1947_s27 = smov 72  }
  0x77   : > { %v1731_v54 = vpop.eup %1730  ;;  %v530_v38 = vunpack.c.l.s4 %v1940_v37  ;;  %v485_v42 = vrot.slane %v474_v33, 5  ;;  %v484_v43 = vsel %vm483_vm3, %v482_v34, %v481_v39  ;;  %vm458_vm6 = vcmask 519168   ;;  %p2825_p12 = scmp.ne.s32.totalorder %s2801_s6, 0 }
  0x78   : > { %v1733_v55 = vpop.eup %1732  ;;  %v389_v56 = vmul.f32 %v1731_v54, %v2173_v5  ;;  %v501_v44 = vunpack.c.0.s8 %v500_v36  ;;  %vm561_vm7 = vcmask 57344   ;;  %vm562_vm8 = vsmask.f32 256 }
  0x79   : > { %v390_v58 = vmul.f32 %v1733_v55, %v2176_v6  ;;  %v531_v45 = vunpack.c.0.s8 %v530_v38  ;;  %v487_v46 = vsel %vm486_vm4, %v485_v42, %v484_v43  ;;  %vm2463_vm9 = vmand %vm561_vm7, %vm562_vm8  ;;  %vm785_vm10 = vcmask 58369  }
  0x7a   : > { %v1735_v57 = vpop.eup %1734  ;;  %596 = vrot.lane.b32.xlu0 %v2191_v14, %s1936_s16  ;;  %822 = vrot.lane.b32.xlu1 %v2191_v14, %s1935_s24  ;;  %v2302_v48 = vsub.s32 %v501_v44, %v2165_v2  ;;  %s1566_s24 = sshll.u32 %s2144_s10, 4  ;;  %vm786_vm11 = vsmask.f32 1280  ;;  %vm672_vm12 = vsmask.f32 7938  ;;  %vm1010_vm15 = vcmask 59394  }
  0x7b   : > { %v1737_v60 = vpop.eup %1736  ;;  %v397_v62 = vpack.c.bf16 %v390_v58, %v389_v56  ;;  %v391_v63 = vmul.f32 %v1735_v57, %v2181_v9  ;;  %v2305_v49 = vsub.s32 %v531_v45, %v2165_v2  ;;  %s2467_s16 = scalar_lea.vmem [#allocation7], %s1566_s24  ;;  %vm2542_vm13 = vmand %vm785_vm10, %vm786_vm11  ;;  %vm1011_vm0 = vsmask.f32 2304 }
  0x7c   : > { %v392_v0 = vmul.f32 %v1737_v60, %v2185_v11  ;;  %v1739_v5 = vpop.eup %1738  ;;  %vm2548_vm14 = vmand %vm561_vm7, %vm672_vm12  ;;  %vm898_vm2 = vsmask.f32 7942  ;;  %vm1235_vm3 = vcmask 60419   ;;  %vm1236_vm4 = vsmask.f32 3328 }
  0x7d   : > { %v407_v3 = vsel %vm402_vm5, %v397_v62, 0  ;;  %v1741_v4 = vpop.eup %1740  ;;  %v393_v9 = vmul.f32 %v1739_v5, %v2189_v13  ;;  %vm2560_vm1 = vmand %vm1010_vm15, %vm1011_vm0  ;;  %vm1123_vm8 = vsmask.f32 7946 }
  0x7e   : > { %1047 = vrot.lane.b32.xlu0 %v2191_v14, %s1937_s12  ;;  %1609 = vmatpush3.bf16.xpose.msra.mxu0 %v407_v3  ;;  %v398_v6 = vpack.c.bf16 %v392_v0, %v391_v63  ;;  %v394_v11 = vmul.f32 %v1741_v4, %v2195_v16  ;;  %v401_v16 = vld [vmem:[%s2792_s3] sm:$0x3]  ;;  %s1602_s12 = sshll.u32 %s1916_s21, 8 }
  0x7f   : > { %1272 = vrot.lane.b32.xlu1 %v2191_v14, %s1938_s13  ;;  %1610 = vmatprep.subr.bf16.mxu0 %v1930_v1  ;;  %v1743_v8 = vpop.eup %1742  ;;  %s1386_s13 = sshll.u32 %s2467_s16, 4  ;;  %s2697_s9 = scalar_lea.hbm %s2793_s4, %s1602_s12  ;;  %s2699_s13 = int_to_ptr.vmem [resolvable:$true] %s1386_s13 }
  0x80   : > { %v410_v7 = vsel %vm402_vm5, %v398_v6, 0  ;;  %v399_v10 = vpack.c.bf16 %v394_v11, %v393_v9  ;;  %v1745_v12 = vpop.eup %1744  ;;  %v395_v17 = vmul.f32 %v1743_v8, %v2199_v18 }
  0x81   : > { %v396_v19 = vmul.f32 %v1745_v12, %v2203_v20 }
  0x82   : > { %v413_v15 = vsel %vm402_vm5, %v399_v10, 0 }
  0x83   : > { %v400_v21 = vpack.c.bf16 %v396_v19, %v395_v17 }
  0x85   : > { %v416_v13 = vsel %vm402_vm5, %v400_v21, 0 }
  0x86   : > { %1611 = vmatpush3.bf16.xpose.msra.mxu0 %v410_v7 }
  0x87   : > { %1612 = vmatprep.subr.bf16.mxu0 %v1930_v1 }
  0x8e   : > { %1613 = vmatpush3.bf16.xpose.msra.mxu0 %v413_v15 }
  0x8f   : > { %1614 = vmatprep.subr.bf16.mxu0 %v1930_v1 }
  0x96   : > { %1615 = vmatpush3.bf16.xpose.msra.mxu0 %v416_v13 }
  0x9d   : > { %1617 = vmatmul.mubr.msk.bf16.vlgmr.msra.gmra.mrb[0].mxu0 %vm402_vm5, %v401_v16  ;;  %vm2569_vm5 = vmand %vm785_vm10, %vm898_vm2  ;;  %vm1348_vm10 = vsmask.f32 7950 }
  0x9e   : > { %vm2599_vm11 = vmand %vm1235_vm3, %vm1348_vm10 }
  0xd8   : > { %v935_v18 = vpop.permute.xlu0 %934  ;;  %v710_v22 = vpop.permute.xlu1 %709 }
  0xdc   : > { %v706_v20 = vpop.permute.xlu0 %705  ;;  %v2290_v23 = vpop.permute.xlu1 %1159 }
  0xe0   : > { %v931_v24 = vpop.permute.xlu0 %930  ;;  %v2292_v1 = vpop.permute.xlu1 %1155 }
  0xe4   : > { %v593_v25 = vpop.permute.xlu0 %592  ;;  %v819_v26 = vpop.permute.xlu1 %818 }
  0xe8   : > { %v1044_v28 = vpop.permute.xlu0 %1043  ;;  %v1269_v29 = vpop.permute.xlu1 %1268 }
  0xec   : > { %v597_v40 = vpop.permute.xlu0 %596  ;;  %v823_v41 = vpop.permute.xlu1 %822 }
  0xf0   : > { %v1048_v47 = vpop.permute.xlu0 %1047 }
  0xf1   : > { %v1273_v51 = vpop.permute.xlu1 %1272 }
 0x170   : > { %v452_v50 = vpop.f32.mrb[0].mxu0 }
 0x171   : > { %v459_v52 = vsel %vm458_vm6, %v452_v50, 0.0  ;;  %v489_v53 = vadd.f32 %v487_v46, %v452_v50  ;;  %v1618_v54 = vpop.f32.mrb[1].mxu0  ;;  %v1046_v55 = vadd.f32 %v1044_v28, %v452_v50  ;;  %v1271_v56 = vadd.f32 %v1269_v29, %v452_v50  ;;  %vm2574_vm6 = vmand %vm1235_vm3, %vm1236_vm4 }
 0x172   : > { %v460_v57 = vrot.slane %v459_v52, 4  ;;  %v455_v58 = vpop.f32.mrb[2].mxu0  ;;  %v708_v59 = vadd.f32 %v706_v20, %v452_v50  ;;  %v595_v60 = vadd.f32 %v593_v25, %v452_v50  ;;  %v933_v61 = vadd.f32 %v931_v24, %v452_v50 }
 0x173   : > { %v496_v62 = vadd.f32 %v2191_v14, %v489_v53  ;;  %v1050_v63 = vadd.f32 %v1048_v47, %v1046_v55  ;;  %v1275_v0 = vadd.f32 %v1273_v51, %v1271_v56  ;;  %v1619_v3 = vpop.f32.mrb[3].mxu0  ;;  %v821_v5 = vadd.f32 %v819_v26, %v452_v50 }
 0x174   : > { %v461_v2 = vadd.f32 %v460_v57, %v459_v52  ;;  %v712_v6 = vadd.f32 %v710_v22, %v708_v59  ;;  %v599_v4 = vadd.f32 %v597_v40, %v595_v60  ;;  %v937_v7 = vadd.f32 %v935_v18, %v933_v61 }
 0x175   : > { %v497_v9 = vpack.c.bf16 %v496_v62, %v496_v62  ;;  %v1051_v11 = vpack.c.bf16 %v1050_v63, %v1050_v63  ;;  %v1276_v8 = vpack.c.bf16 %v1275_v0, %v1275_v0  ;;  %v825_v10 = vadd.f32 %v823_v41, %v821_v5 }
 0x176   : > { %v462_v12 = vrot.slane %v461_v2, 2  ;;  %v713_v15 = vpack.c.bf16 %v712_v6, %v712_v6  ;;  %v600_v17 = vpack.c.bf16 %v599_v4, %v599_v4  ;;  %v938_v19 = vpack.c.bf16 %v937_v7, %v937_v7 }
 0x177   : > { %v2309_v21 = vrot.slane %v497_v9, %v2302_v48  ;;  %v1059_v14 = vrot.slane %v1051_v11, %v2302_v48  ;;  %v1284_v13 = vrot.slane %v1276_v8, %v2302_v48  ;;  %v826_v16 = vpack.c.bf16 %v825_v10, %v825_v10 }
 0x178   : > { %v463_v22 = vadd.f32 %v462_v12, %v461_v2  ;;  %v721_v18 = vrot.slane %v713_v15, %v2302_v48  ;;  %v2315_v20 = vrot.slane %v600_v17, %v2302_v48  ;;  %v946_v24 = vrot.slane %v938_v19, %v2302_v48 }
 0x179   : > { %v1060_v25 = vcombine.high %v1059_v14, %v1059_v14  ;;  %v2319_v26 = vrot.slane %v1059_v14, %v2302_v48  ;;  %v1285_v27 = vcombine.high %v1284_v13, %v1284_v13  ;;  %v2322_v29 = vrot.slane %v1284_v13, %v2302_v48 }
 0x17a   : > { %v464_v28 = vrot.slane %v463_v22, 1  ;;  %v729_v30 = vrot.slane %v721_v18, %v2302_v48  ;;  %v616_v31 = vrot.slane %v2315_v20, %v2302_v48  ;;  %v954_v34 = vrot.slane %v946_v24, %v2302_v48 }
 0x17b   : > { %v2329_v32 = vrot.slane %v1060_v25, %v2302_v48  ;;  %v2332_v33 = vrot.slane %v1285_v27, %v2302_v48  ;;  %v2336_v35 = vrot.slane %v826_v16, %v2302_v48  ;;  %v1158_v39 = vadd.f32 %v2292_v1, %v452_v50 }
 0x17c   : > { %v465_v36 = vadd.f32 %v464_v28, %v463_v22  ;;  %v1581_v37 = vpack.i.b16 %v729_v30, %v729_v30  ;;  %v1579_v38 = vpack.i.b16 %v616_v31, %v616_v31  ;;  %v1585_v40 = vpack.i.b16 %v954_v34, %v954_v34 }
 0x17d   : > { %v842_v41 = vrot.slane %v2336_v35, %v2302_v48  ;;  %v1587_v42 = vpack.i.b16 %v2319_v26, %v2319_v26  ;;  %v1591_v43 = vpack.i.b16 %v2322_v29, %v2322_v29  ;;  %v1162_v47 = vadd.f32 %v2290_v23, %v1158_v39 }
 0x17e   : > { %v2345_v44 = vmul.f32 0.25, %v465_v36  ;;  %v751_v45 = vrot.slane %v1581_v37, %v2305_v49  ;;  %v638_v46 = vrot.slane %v1579_v38, %v2305_v49  ;;  %v976_v1 = vrot.slane %v1585_v40, %v2305_v49 }
 0x17f   : > { %v1583_v50 = vpack.i.b16 %v842_v41, %v842_v41  ;;  %v1089_v51 = vrot.slane %v1587_v42, %v2305_v49  ;;  %v2353_v52 = vrot.slane %v1591_v43, %v2305_v49  ;;  %v1163_v53 = vpack.c.bf16 %v1162_v47, %v1162_v47 }
 0x180   : > { %773 = vrot.lane.b32.xlu1 %v751_v45, %s1941_s29  ;;  %660 = vrot.lane.b32.xlu0 %v638_v46, %s1942_s11  ;;  %v722_v54 = vcombine.high %v721_v18, %v721_v18  ;;  %v947_v55 = vcombine.high %v946_v24, %v946_v24  ;;  %v738_v56 = vunpack.i.h.s16 %v729_v30  ;;  %577 = vst.msk [vmem:[%s2357_s30] sm:$0x1] %vm561_vm7, %v2345_v44  ;;  %v963_v57 = vunpack.i.h.s16 %v954_v34 }
 0x181   : > { %v864_v23 = vrot.slane %v1583_v50, %v2305_v49  ;;  %v625_v58 = vunpack.i.h.s16 %v616_v31  ;;  %v851_v59 = vunpack.i.h.s16 %v842_v41  ;;  %v1171_v60 = vrot.slane %v1163_v53, %v2302_v48 }
 0x182   : > { %v736_v61 = vrot.slane %v722_v54, %v2302_v48  ;;  %v2366_v62 = vrot.slane %v947_v55, %v2302_v48  ;;  %v2368_v63 = vpack.i.b16 %v738_v56, %v738_v56  ;;  %v2370_v0 = vpack.i.b16 %v963_v57, %v963_v57 }
 0x183   : > { %v2372_v3 = vpack.i.b16 %v625_v58, %v625_v58  ;;  %v2374_v5 = vpack.i.b16 %v851_v59, %v851_v59  ;;  %v609_v2 = vcombine.high %v2315_v20, %v2315_v20  ;;  %v1179_v6 = vrot.slane %v1171_v60, %v2302_v48 }
 0x184   : > { %998 = vrot.lane.b32.xlu1 %v976_v1, %s1943_s15  ;;  %886 = vrot.lane.b32.xlu0 %v864_v23, %s1944_s14  ;;  %v1582_v4 = vpack.i.b16 %v736_v61, %v736_v61  ;;  %v1586_v7 = vpack.i.b16 %v2366_v62, %v2366_v62  ;;  %v1076_v9 = vunpack.i.h.s16 %v2319_v26  ;;  %v758_v11 = vrot.slane %v2368_v63, %v2305_v49 }
 0x185   : > { %v1172_v8 = vcombine.high %v1171_v60, %v1171_v60  ;;  %v983_v10 = vrot.slane %v2370_v0, %v2305_v49  ;;  %v645_v12 = vrot.slane %v2372_v3, %v2305_v49  ;;  %v1589_v15 = vpack.i.b16 %v1179_v6, %v1179_v6  ;;  %v788_v3 = vld [vmem:[%s2467_s16] sm:$0x2] }
 0x186   : > { %v765_v17 = vrot.slane %v1582_v4, %v2305_v49  ;;  %v2392_v19 = vrot.slane %v1586_v7, %v2305_v49  ;;  %v1188_v14 = vunpack.i.h.s16 %v1179_v6  ;;  %v871_v16 = vrot.slane %v2374_v5, %v2305_v49 }
 0x187   : > { %v1186_v13 = vrot.slane %v1172_v8, %v2302_v48  ;;  %v623_v22 = vrot.slane %v609_v2, %v2302_v48  ;;  %v2398_v18 = vpack.i.b16 %v1076_v9, %v1076_v9  ;;  %v1201_v20 = vrot.slane %v1589_v15, %v2305_v49 }
 0x188   : > { %1111 = vrot.lane.b32.xlu0 %v1089_v51, %s1945_s28  ;;  %v2402_v24 = vpack.i.b16 %v1188_v14, %v1188_v14  ;;  %v835_v25 = vcombine.high %v2336_v35, %v2336_v35  ;;  %v1301_v26 = vunpack.i.h.s16 %v2322_v29  ;;  %v1588_v31 = vpack.i.b16 %v2329_v32, %v2329_v32 }
 0x189   : > { %v1590_v27 = vpack.i.b16 %v1186_v13, %v1186_v13  ;;  %v1580_v28 = vpack.i.b16 %v623_v22, %v623_v22  ;;  %v1096_v30 = vrot.slane %v2398_v18, %v2305_v49  ;;  %1223 = vrot.lane.b32.xlu1 %v1201_v20, %s1946_s25  ;;  %v1592_v29 = vpack.i.b16 %v2332_v33, %v2332_v33  ;;  %v570_v20 = vld [vmem:[%s2467_s16 + $0x8] sm:$0x1] }
 0x18a   : > { %v1208_v34 = vrot.slane %v2402_v24, %v2305_v49  ;;  %v849_v36 = vrot.slane %v835_v25, %v2302_v48  ;;  %v2415_v35 = vpack.i.b16 %v1301_v26, %v1301_v26  ;;  %v2424_v39 = vrot.slane %v1588_v31, %v2305_v49  ;;  %v573_v26 = vld [vmem:[%s2467_s16 + $0xc] sm:$0x1] }
 0x18b   : > { %v1215_v37 = vrot.slane %v1590_v27, %v2305_v49  ;;  %v2421_v38 = vrot.slane %v1580_v28, %v2305_v49  ;;  %v627_v40 = vunpack.i.h.s16 %v623_v22  ;;  %v2431_v43 = vrot.slane %v1592_v29, %v2305_v49  ;;  %v567_v22 = vld [vmem:[%s2467_s16 + $0x4] sm:$0x1] }
 0x18c   : > { %1336 = vrot.lane.b32.xlu0 %v2353_v52, %s1947_s27  ;;  %v1584_v41 = vpack.i.b16 %v849_v36, %v849_v36  ;;  %v1321_v42 = vrot.slane %v2415_v35, %v2305_v49  ;;  %v740_v45 = vunpack.i.h.s16 %v736_v61  ;;  %v853_v47 = vunpack.i.h.s16 %v849_v36 }
 0x18d   : > { %v2433_v46 = vpack.i.b16 %v627_v40, %v627_v40  ;;  %v965_v1 = vunpack.i.h.s16 %v2366_v62  ;;  %v1078_v50 = vunpack.i.h.s16 %v2329_v32  ;;  %800 = vrot.lane.b32.xlu1 %v2345_v44, %s1941_s29  ;;  %v1190_v53 = vunpack.i.h.s16 %v1186_v13 }
 0x18e   : > { %v878_v51 = vrot.slane %v1584_v41, %v2305_v49  ;;  %v744_v52 = vpack.i.b16 %v740_v45, %v740_v45  ;;  %v1303_v54 = vunpack.i.h.s16 %v2332_v33  ;;  %v857_v56 = vpack.i.b16 %v853_v47, %v853_v47 }
 0x18f   : > { %v659_v55 = vrot.slane %v2433_v46, %v2305_v49  ;;  %v969_v23 = vpack.i.b16 %v965_v1, %v965_v1  ;;  %v1082_v57 = vpack.i.b16 %v1078_v50, %v1078_v50  ;;  %v506_v58 = vcombine.high %v2309_v21, %v2309_v21 }
 0x190   : > { %687 = vrot.lane.b32.xlu0 %v2345_v44, %s1942_s11  ;;  %v772_v32 = vrot.slane %v744_v52, %v2305_v49  ;;  %v1194_v59 = vpack.i.b16 %v1190_v53, %v1190_v53  ;;  %v1307_v60 = vpack.i.b16 %v1303_v54, %v1303_v54  ;;  %v885_v61 = vrot.slane %v857_v56, %v2305_v49 }
 0x191   : > { %v997_v33 = vrot.slane %v969_v23, %v2305_v49  ;;  %v1110_v62 = vrot.slane %v1082_v57, %v2305_v49  ;;  %v513_v2 = vrot.slane %v2309_v21, %v2302_v48  ;;  %777 = vrot.lane.b32.xlu1 %v765_v17, %s1941_s29  ;;  %v564_v21 = vld [vmem:[%s2467_s16] sm:$0x1]  ;;  %v520_v15 = vrot.slane %v506_v58, %v2302_v48  ;;  %v1019_v58 = vld [vmem:[%s2467_s16 + $0x8] sm:$0x4] }
 0x192   : > { %v1222_v6 = vrot.slane %v1194_v59, %v2305_v49  ;;  %v1335_v4 = vrot.slane %v1307_v60, %v2305_v49 }
 0x193   : > { %v1577_v7 = vpack.i.b16 %v513_v2, %v513_v2  ;;  %v522_v8 = vunpack.i.h.s16 %v513_v2  ;;  %v1578_v17 = vpack.i.b16 %v520_v15, %v520_v15  ;;  %v524_v14 = vunpack.i.h.s16 %v520_v15 }
 0x194   : > { %775 = vrot.lane.b32.xlu0 %v758_v11, %s1941_s29 }
 0x195   : > { %v535_v63 = vrot.slane %v1577_v7, %v2305_v49  ;;  %1002 = vrot.lane.b32.xlu1 %v2392_v19, %s1943_s15  ;;  %v526_v11 = vpack.i.b16 %v522_v8, %v522_v8  ;;  %v549_v19 = vrot.slane %v1578_v17, %v2305_v49  ;;  %v528_v25 = vpack.i.b16 %v524_v14, %v524_v14  ;;  %v1241_v7 = vld [vmem:[%s2467_s16 + $0x4] sm:$0x8] }
 0x197   : > { %v565_v13 = vsel %vm2463_vm9, %v535_v63, %v564_v21  ;;  %v542_v48 = vrot.slane %v526_v11, %v2305_v49  ;;  %v571_v28 = vsel %vm2463_vm9, %v549_v19, %v570_v20  ;;  %v556_v31 = vrot.slane %v528_v25, %v2305_v49 }
 0x198   : > { %1000 = vrot.lane.b32.xlu0 %v983_v10, %s1943_s15  ;;  %566 = vst [vmem:[%s2467_s16] sm:$0x1] %v565_v13  ;;  %572 = vst [vmem:[%s2467_s16 + $0x8] sm:$0x1] %v571_v28 }
 0x199   : > { %1227 = vrot.lane.b32.xlu1 %v1215_v37, %s1946_s25  ;;  %v568_v27 = vsel %vm2463_vm9, %v542_v48, %v567_v22  ;;  %v574_v0 = vsel %vm2463_vm9, %v556_v31, %v573_v26  ;;  %vm2586_vm9 = vmand %vm1010_vm15, %vm1123_vm8 }
 0x19a   : > { %569 = vst [vmem:[%s2467_s16 + $0x4] sm:$0x1] %v568_v27  ;;  %575 = vst [vmem:[%s2467_s16 + $0xc] sm:$0x1] %v574_v0 }
 0x19c   : > { %1225 = vrot.lane.b32.xlu0 %v1208_v34, %s1946_s25 }
 0x19d   : > { %662 = vrot.lane.b32.xlu1 %v645_v12, %s1942_s11 }
 0x19f   : > { %v674_v12 = vld [vmem:[%s2467_s16] sm:$0x1]  ;;  %v680_v17 = vld [vmem:[%s2467_s16 + $0x8] sm:$0x1] }
 0x1a0   : > { %664 = vrot.lane.b32.xlu0 %v2421_v38, %s1942_s11  ;;  %v1238_v38 = vld [vmem:[%s2467_s16] sm:$0x8] }
 0x1a1   : > { %888 = vrot.lane.b32.xlu1 %v871_v16, %s1944_s14  ;;  %v677_v15 = vld [vmem:[%s2467_s16 + $0x4] sm:$0x1] }
 0x1a4   : > { %890 = vrot.lane.b32.xlu0 %v878_v51, %s1944_s14  ;;  %v794_v51 = vld [vmem:[%s2467_s16 + $0x8] sm:$0x2] }
 0x1a5   : > { %1113 = vrot.lane.b32.xlu1 %v1096_v30, %s1945_s28  ;;  %v1013_v30 = vld [vmem:[%s2467_s16] sm:$0x4] }
 0x1a8   : > { %1115 = vrot.lane.b32.xlu0 %v2424_v39, %s1945_s28 }
 0x1a9   : > { %1338 = vrot.lane.b32.xlu1 %v1321_v42, %s1947_s27 }
 0x1ac   : > { %1340 = vrot.lane.b32.xlu0 %v2431_v43, %s1947_s27 }
 0x1ad   : > { %1025 = vrot.lane.b32.xlu1 %v2345_v44, %s1943_s15 }
 0x1b0   : > { %779 = vrot.lane.b32.xlu0 %v772_v32, %s1941_s29  ;;  %s1597_s29 = sshll.u32 %s1916_s21, 7  ;;  %s1367_s21 = scalar_lea.sflag [#allocation4], %s2144_s10 }
 0x1b1   : > { %666 = vrot.lane.b32.xlu1 %v659_v55, %s1942_s11  ;;  %v791_v55 = vld [vmem:[%s2467_s16 + $0x4] sm:$0x2]  ;;  %s1403_s11 = sshll.u32 %s2357_s30, 4  ;;  %s2716_s11 = int_to_ptr.vmem [resolvable:$true] %s1403_s11 }
 0x1b4   : > { %1004 = vrot.lane.b32.xlu0 %v997_v33, %s1943_s15 }
 0x1b5   : > { %892 = vrot.lane.b32.xlu1 %v885_v61, %s1944_s14  ;;  %v1016_v61 = vld [vmem:[%s2467_s16 + $0x4] sm:$0x4] }
 0x1b8   : > { %1229 = vrot.lane.b32.xlu0 %v1222_v6, %s1946_s25 }
 0x1b9   : > { %1117 = vrot.lane.b32.xlu1 %v1110_v62, %s1945_s28  ;;  %v1244_v62 = vld [vmem:[%s2467_s16 + $0x8] sm:$0x8] }
 0x1bc   : > { %912 = vrot.lane.b32.xlu0 %v2345_v44, %s1944_s14 }
 0x1bd   : > { %1342 = vrot.lane.b32.xlu1 %v1335_v4, %s1947_s27 }
 0x1c0   : > { %1137 = vrot.lane.b32.xlu0 %v2345_v44, %s1945_s28  ;;  %s2714_s28 = scalar_lea.hbm %s2794_s5, %s1597_s29 }
 0x1c1   : > { %1250 = vrot.lane.b32.xlu1 %v2345_v44, %s1946_s25  ;;  %s1806_s25 = scalar_lea.vmem %s2699_s13, 256 }
 0x1c2   : > { %p1807_p3 = scmp.ne.s32.totalorder %s2699_s13, %s1806_s25 }
 0x1c4   : > { %1362 = vrot.lane.b32.xlu0 %v2345_v44, %s1947_s27  ;;  %p1808_p13 = pnand %p1807_p3, %p2825_p12  ;;  %s1948_s27 = smov [#allocation7]  }
 0x1c5   : > { %s1810_s24 = sshll.u32 %s1948_s27, 4  ;;  %s1811_s24 = int_to_ptr.vmem [resolvable:$false] %s1810_s24 }
 0x1c6   : > { %p1809_p7 = pneg %p1808_p13  ;;  %p1813_p10 = scmp.lt.s32.totalorder %s2699_s13, %s1811_s24 }
 0x1f2   : > { %v774_v10 = vpop.permute.xlu1 %773  ;;  %v661_v44 = vpop.permute.xlu0 %660 }
 0x1f3   : > { %v789_v16 = vsel %vm2542_vm13, %v774_v10, %v788_v3  ;;  %v675_v18 = vsel %vm2548_vm14, %v661_v44, %v674_v12 }
 0x1f4   : > { %790 = vst [vmem:[%s2467_s16] sm:$0x2] %v789_v16  ;;  %676 = vst [vmem:[%s2467_s16] sm:$0x1] %v675_v18 }
 0x1f6   : > { %v999_v34 = vpop.permute.xlu1 %998  ;;  %v887_v36 = vpop.permute.xlu0 %886 }
 0x1f7   : > { %v1014_v35 = vsel %vm2560_vm1, %v999_v34, %v1013_v30 }
 0x1f8   : > { %1015 = vst [vmem:[%s2467_s16] sm:$0x4] %v1014_v35  ;;  %v797_v35 = vld [vmem:[%s2467_s16 + $0xc] sm:$0x2] }
 0x1fa   : > { %v1112_v39 = vpop.permute.xlu0 %1111 }
 0x1fb   : > { %v900_v40 = vld [vmem:[%s2467_s16] sm:$0x2]  ;;  %v1224_v42 = vpop.permute.xlu1 %1223 }
 0x1fc   : > { %v901_v41 = vsel %vm2569_vm5, %v887_v36, %v900_v40  ;;  %v1239_v43 = vsel %vm2574_vm6, %v1224_v42, %v1238_v38  ;;  %v683_v40 = vld [vmem:[%s2467_s16 + $0xc] sm:$0x1]  ;;  %v1022_v42 = vld [vmem:[%s2467_s16 + $0xc] sm:$0x4] }
 0x1fd   : > { %902 = vst [vmem:[%s2467_s16] sm:$0x2] %v901_v41  ;;  %1240 = vst [vmem:[%s2467_s16] sm:$0x8] %v1239_v43 }
 0x1fe   : > { %v1337_v46 = vpop.permute.xlu0 %1336 }
 0x1ff   : > { %v1125_v47 = vld [vmem:[%s2467_s16] sm:$0x4]  ;;  %v801_v50 = vpop.permute.xlu1 %800 }
 0x200   : > { %v1126_v1 = vsel %vm2586_vm9, %v1112_v39, %v1125_v47  ;;  %803 = vst.msk [vmem:[%s2357_s30 + $0x2] sm:$0x1] %vm561_vm7, %v801_v50 }
 0x201   : > { %1127 = vst [vmem:[%s2467_s16] sm:$0x4] %v1126_v1  ;;  %v1247_v1 = vld [vmem:[%s2467_s16 + $0xc] sm:$0x8] }
 0x202   : > { %v688_v52 = vpop.permute.xlu0 %687 }
 0x203   : > { %690 = vst.msk [vmem:[%s2357_s30 + $0x1] sm:$0x1] %vm561_vm7, %v688_v52  ;;  %v778_v54 = vpop.permute.xlu1 %777 }
 0x204   : > { %v1350_v56 = vld [vmem:[%s2467_s16] sm:$0x8]  ;;  %v795_v23 = vsel %vm2542_vm13, %v778_v54, %v794_v51 }
 0x205   : > { %v1351_v57 = vsel %vm2599_vm11, %v1337_v46, %v1350_v56  ;;  %796 = vst [vmem:[%s2467_s16 + $0x8] sm:$0x2] %v795_v23 }
 0x206   : > { %v776_v32 = vpop.permute.xlu0 %775  ;;  %1352 = vst [vmem:[%s2467_s16] sm:$0x8] %v1351_v57 }
 0x207   : > { %v792_v59 = vsel %vm2542_vm13, %v776_v32, %v791_v55  ;;  %v1003_v60 = vpop.permute.xlu1 %1002 }
 0x208   : > { %793 = vst [vmem:[%s2467_s16 + $0x4] sm:$0x2] %v792_v59  ;;  %v1020_v33 = vsel %vm2560_vm1, %v1003_v60, %v1019_v58 }
 0x209   : > { %1021 = vst [vmem:[%s2467_s16 + $0x8] sm:$0x4] %v1020_v33 }
 0x20a   : > { %v1001_v2 = vpop.permute.xlu0 %1000 }
 0x20b   : > { %v1017_v6 = vsel %vm2560_vm1, %v1001_v2, %v1016_v61  ;;  %v1228_v4 = vpop.permute.xlu1 %1227 }
 0x20c   : > { %1018 = vst [vmem:[%s2467_s16 + $0x4] sm:$0x4] %v1017_v6  ;;  %v1245_v9 = vsel %vm2574_vm6, %v1228_v4, %v1244_v62  ;;  %v906_v19 = vld [vmem:[%s2467_s16 + $0x8] sm:$0x2] }
 0x20d   : > { %1246 = vst [vmem:[%s2467_s16 + $0x8] sm:$0x8] %v1245_v9 }
 0x20e   : > { %v1226_v21 = vpop.permute.xlu0 %1225 }
 0x20f   : > { %v1242_v8 = vsel %vm2574_vm6, %v1226_v21, %v1241_v7  ;;  %v663_v63 = vpop.permute.xlu1 %662  ;;  %v903_v20 = vld [vmem:[%s2467_s16 + $0x4] sm:$0x2] }
 0x210   : > { %1243 = vst [vmem:[%s2467_s16 + $0x4] sm:$0x8] %v1242_v8  ;;  %v678_v11 = vsel %vm2548_vm14, %v663_v63, %v677_v15  ;;  %v1131_v0 = vld [vmem:[%s2467_s16 + $0x8] sm:$0x4] }
 0x211   : > { %679 = vst [vmem:[%s2467_s16 + $0x4] sm:$0x1] %v678_v11 }
 0x212   : > { %v665_v14 = vpop.permute.xlu0 %664 }
 0x213   : > { %v681_v13 = vsel %vm2548_vm14, %v665_v14, %v680_v17  ;;  %v889_v22 = vpop.permute.xlu1 %888  ;;  %v1128_v28 = vld [vmem:[%s2467_s16 + $0x4] sm:$0x4] }
 0x214   : > { %682 = vst [vmem:[%s2467_s16 + $0x8] sm:$0x1] %v681_v13  ;;  %v904_v48 = vsel %vm2569_vm5, %v889_v22, %v903_v20  ;;  %v1356_v18 = vld [vmem:[%s2467_s16 + $0x8] sm:$0x8] }
 0x215   : > { %905 = vst [vmem:[%s2467_s16 + $0x4] sm:$0x2] %v904_v48 }
 0x216   : > { %v891_v25 = vpop.permute.xlu0 %890 }
 0x217   : > { %v907_v26 = vsel %vm2569_vm5, %v891_v25, %v906_v19  ;;  %v1114_v27 = vpop.permute.xlu1 %1113  ;;  %v1353_v12 = vld [vmem:[%s2467_s16 + $0x4] sm:$0x8] }
 0x218   : > { %908 = vst [vmem:[%s2467_s16 + $0x8] sm:$0x2] %v907_v26  ;;  %v1129_v31 = vsel %vm2586_vm9, %v1114_v27, %v1128_v28 }
 0x219   : > { %1130 = vst [vmem:[%s2467_s16 + $0x4] sm:$0x4] %v1129_v31 }
 0x21a   : > { %v1116_v3 = vpop.permute.xlu0 %1115 }
 0x21b   : > { %v1132_v10 = vsel %vm2586_vm9, %v1116_v3, %v1131_v0  ;;  %v1339_v44 = vpop.permute.xlu1 %1338 }
 0x21c   : > { %1133 = vst [vmem:[%s2467_s16 + $0x8] sm:$0x4] %v1132_v10  ;;  %v1354_v16 = vsel %vm2599_vm11, %v1339_v44, %v1353_v12 }
 0x21d   : > { %1355 = vst [vmem:[%s2467_s16 + $0x4] sm:$0x8] %v1354_v16 }
 0x21e   : > { %v1341_v30 = vpop.permute.xlu0 %1340 }
 0x21f   : > { %v1357_v34 = vsel %vm2599_vm11, %v1341_v30, %v1356_v18  ;;  %v1026_v36 = vpop.permute.xlu1 %1025 }
 0x220   : > { %1358 = vst [vmem:[%s2467_s16 + $0x8] sm:$0x8] %v1357_v34  ;;  %1028 = vst.msk [vmem:[%s2357_s30 + $0x4] sm:$0x1] %vm561_vm7, %v1026_v36 }
 0x222   : > { %v780_v38 = vpop.permute.xlu0 %779 }
 0x223   : > { %v798_v39 = vsel %vm2542_vm13, %v780_v38, %v797_v35  ;;  %v667_v41 = vpop.permute.xlu1 %666 }
 0x224   : > { %799 = vst [vmem:[%s2467_s16 + $0xc] sm:$0x2] %v798_v39  ;;  %v684_v43 = vsel %vm2548_vm14, %v667_v41, %v683_v40 }
 0x225   : > { %685 = vst [vmem:[%s2467_s16 + $0xc] sm:$0x1] %v684_v43 }
 0x226   : > { %v1005_v46 = vpop.permute.xlu0 %1004 }
 0x227   : > { %v1023_v47 = vsel %vm2560_vm1, %v1005_v46, %v1022_v42  ;;  %v893_v49 = vpop.permute.xlu1 %892 }
 0x228   : > { %1024 = vst [vmem:[%s2467_s16 + $0xc] sm:$0x4] %v1023_v47 }
 0x22a   : > { %v1230_v50 = vpop.permute.xlu0 %1229 }
 0x22b   : > { %v909_v51 = vld [vmem:[%s2467_s16 + $0xc] sm:$0x2]  ;;  %v1248_v52 = vsel %vm2574_vm6, %v1230_v50, %v1247_v1  ;;  %v1118_v54 = vpop.permute.xlu1 %1117 }
 0x22c   : > { %v910_v5 = vsel %vm2569_vm5, %v893_v49, %v909_v51  ;;  %1249 = vst [vmem:[%s2467_s16 + $0xc] sm:$0x8] %v1248_v52 }
 0x22d   : > { %911 = vst [vmem:[%s2467_s16 + $0xc] sm:$0x2] %v910_v5 }
 0x22e   : > { %v913_v24 = vpop.permute.xlu0 %912 }
 0x22f   : > { %v1134_v55 = vld [vmem:[%s2467_s16 + $0xc] sm:$0x4]  ;;  %915 = vst.msk [vmem:[%s2357_s30 + $0x3] sm:$0x1] %vm561_vm7, %v913_v24  ;;  %v1343_v29 = vpop.permute.xlu1 %1342 }
 0x230   : > { %v1135_v37 = vsel %vm2586_vm9, %v1118_v54, %v1134_v55 }
 0x231   : > { %1136 = vst [vmem:[%s2467_s16 + $0xc] sm:$0x4] %v1135_v37 }
 0x232   : > { %v1138_v56 = vpop.permute.xlu0 %1137 }
 0x233   : > { %v1359_v23 = vld [vmem:[%s2467_s16 + $0xc] sm:$0x8]  ;;  %1140 = vst.msk [vmem:[%s2357_s30 + $0x5] sm:$0x1] %vm561_vm7, %v1138_v56  ;;  %v1251_v57 = vpop.permute.xlu1 %1250 }
 0x234   : > { %v1360_v45 = vsel %vm2599_vm11, %v1343_v29, %v1359_v23  ;;  %1253 = vst.msk [vmem:[%s2357_s30 + $0x6] sm:$0x1] %vm561_vm7, %v1251_v57 }
 0x235   : > { %1361 = vst [vmem:[%s2467_s16 + $0xc] sm:$0x8] %v1360_v45  ;;  %s1812_s16 = scalar_lea.vmem %s1811_s24, 512 }
 0x236   : > { %v1363_v58 = vpop.permute.xlu0 %1362  ;;  %p1814_p9 = scmp.lt.s32.totalorder %s1812_s16, %s1806_s25 }
 0x238   : > { %p1815_p11 = por %p1814_p9, %p1813_p10 }
 0x23a   : > { %p1816_p1 = pnand %p1815_p11, %p1809_p7 }
 0x23c   : > { %1819 = shalt.err (!%p1816_p1)
}
 0x23d   : > { %s1820_s12 = scalar_lea.hbm %s2697_s9, 256  ;;  %s1824_s29 = scalar_lea.hbm %s2793_s4, 512 }
 0x23e   : > { %p1821_p6 = scmp.ne.s32.totalorder %s2697_s9, %s1820_s12  ;;  %p1825_p4 = scmp.lt.u32.totalorder %s2697_s9, %s2793_s4 }
 0x23f   : > { %p1826_p8 = scmp.lt.u32.totalorder %s1824_s29, %s1820_s12  ;;  %p1828_p3 = scmp.lt.u32.totalorder %s1820_s12, %s2697_s9 }
 0x240   : > { %p1822_p2 = pnand %p1821_p6, %p2825_p12 }
 0x241   : > { %p1827_p0 = por %p1826_p8, %p1825_p4 }
 0x242   : > { %p1823_p5 = pneg %p1822_p2 }
 0x243   : > { %p1829_p13 = por %p1828_p3, %p1827_p0 }
 0x245   : > { %p1830_p7 = pnand %p1829_p13, %p1823_p5 }
 0x247   : > { %1833 = shalt.err (!%p1830_p7)
}
 0x248   : > { %s1949_s25 = smov 64   ;;  %s1950_s27 = smov 4   ;;  %1365 = vst.msk [vmem:[%s2357_s30 + $0x7] sm:$0x1] %vm561_vm7, %v1363_v58 }
 0x249   : > { %1624 = dma.vmem_to_hbm [thread:$0]  (%p2825_p12), %s2699_s13, 256, %s2697_s9, %s1367_s21, %s1949_s25, %s1949_s25, %s1950_s27  }
 0x24a   : > { %s1372_s24 = scalar_lea.sflag [#allocation9], %s2144_s10  ;;  %s1834_s16 = scalar_lea.vmem %s2716_s11, 128 }
 0x24b   : > { %p1835_p10 = scmp.ne.s32.totalorder %s2716_s11, %s1834_s16  ;;  %s1951_s12 = smov [#allocation8]  }
 0x24c   : > { %s1838_s17 = sshll.u32 %s1951_s12, 4  ;;  %s1839_s17 = int_to_ptr.vmem [resolvable:$false] %s1838_s17 }
 0x24d   : > { %p1836_p9 = pnand %p1835_p10, %p2825_p12  ;;  %s1840_s0 = scalar_lea.vmem %s1839_s17, 256 }
 0x24e   : > { %p1841_p1 = scmp.lt.s32.totalorder %s2716_s11, %s1839_s17  ;;  %p1842_p6 = scmp.lt.s32.totalorder %s1840_s0, %s1834_s16 }
 0x24f   : > { %p1837_p11 = pneg %p1836_p9 }
 0x250   : > { %p1843_p2 = por %p1842_p6, %p1841_p1 }
 0x252   : > { %p1844_p5 = pnand %p1843_p2, %p1837_p11 }
 0x254   : > { %1847 = shalt.err (!%p1844_p5)
}
 0x255   : > { %s1848_s10 = scalar_lea.hbm %s2714_s28, 128  ;;  %s1852_s9 = scalar_lea.hbm %s2794_s5, 256 }
 0x256   : > { %p1849_p4 = scmp.ne.s32.totalorder %s2714_s28, %s1848_s10  ;;  %p1853_p3 = scmp.lt.u32.totalorder %s2714_s28, %s2794_s5 }
 0x257   : > { %p1854_p13 = scmp.lt.u32.totalorder %s1852_s9, %s1848_s10  ;;  %p1856_p10 = scmp.lt.u32.totalorder %s1848_s10, %s2714_s28 }
 0x258   : > { %p1850_p8 = pnand %p1849_p4, %p2825_p12 }
 0x259   : > { %p1855_p7 = por %p1854_p13, %p1853_p3 }
 0x25a   : > { %p1851_p0 = pneg %p1850_p8 }
 0x25b   : > { %p1857_p9 = por %p1856_p10, %p1855_p7 }
 0x25d   : > { %p1858_p11 = pnand %p1857_p9, %p1851_p0 }
 0x25f   : > { %1861 = shalt.err (!%p1858_p11)
}
 0x260   : > { %1625 = dma.vmem_to_hbm [thread:$0]  (%p2825_p12), %s2716_s11, 128, %s2714_s28, %s1372_s24  }
 0x261 PF: > { %s1415_s15 = sand.u32 1, %s1904_s18   ;;  %p2826_p1 = scmp.ne.s32.totalorder %s2802_s8, 0 }
 0x262   : > { %p2827_p6 = scmp.ge.s32.totalorder %s1924_s23, 2  ;;  %s1416_s14 = scalar_lea.sflag [#allocation4], %s1415_s15 }
 0x264   : > { %p1636_p2 = pnand %p2827_p6, %p2826_p1 }
 0x266   : > { %1895 = dma.done.wait (!%p1636_p2), %s1416_s14, 256  }
 0x267   : > { %1897 = vsyncadd (!%p1636_p2), %s1416_s14, 4294967040  ;;  %s1425_s25 = scalar_lea.sflag [#allocation9], %s1415_s15 }
 0x268   : > { %1899 = dma.done.wait (!%p1636_p2), %s1425_s25, 128  }
 0x269   : > { %1901 = vsyncadd (!%p1636_p2), %s1425_s25, 4294967168  ;;  %s28_s23 = sadd.s32 1, %s1924_s23   ;;  %s2828_s18 = smov %s1908_s19 }
 0x26a   : > { %p25_p5 = scmp.ge.s32.totalorder %s28_s23, 4   ;;  %s2829_s19 = smov %s1912_s20 }
 0x26b   : > { %s2830_s20 = smov %s2038_s7  ;;  %s2831_s21 = smov %s1920_s22 }
 0x26c   : > { %s2832_s22 = smov %s2834_s26  ;;  %27 = sbr.rel (!%p25_p5) target bundleno = 12 (0xc), region = 114 }
 0x273   :  { %1430 = vsyncpa [#allocation3], 1 }
 0x274   :  { %1432 = vsyncpa [#allocation3 + $0x1], 1 }
 0x275   :  { %1433 = vsyncpa [#allocation6], 1 }
 0x276   :  { %1435 = vsyncpa [#allocation6 + $0x1], 1 }
 0x277   :  { %1436 = vsyncpa [#allocation4], 1 }
 0x278   :  { %1438 = vsyncpa [#allocation4 + $0x1], 1 }
 0x279   :  { %1439 = vsyncpa [#allocation9], 1 }
 0x27a   :  { %1441 = vsyncpa [#allocation9 + $0x1], 1 }

</bundles_post_ra>
